<compile_context>
chip_gen: v5e
topology: v5e:2x2
jax: 0.10.0
libtpu: 0.0.40
codegen_flags: <defaults>
</compile_context>

<pallas_src>
import functools

import jax
import jax.numpy as jnp
from jax import lax
from jax.experimental import pallas as pl
from jax.experimental.pallas import tpu as pltpu


def _round_up(x, m):
    return ((x + m - 1) // m) * m


def _vmem_cap_bytes():
    """~75% of physical VMEM when detectable; 48 MiB fallback (safe on v7x)."""
    try:
        return int(0.75 * pltpu.get_tpu_info().vmem_capacity_bytes)
    except Exception:  # best-effort hardware query only
        return 48 * 1024 * 1024


def _basetl_kernel(patches_ref, wconv_ref, bconv_ref, wfc_ref, bfc_ref,
                   out_ref, acc_ref, *, hw_total, hw_pad, inv_hw):
    """One (batch-tile, spatial-tile) grid step.

    patches_ref: [BT, K8, THW] bf16   K-major im2col patches (HW on lanes)
    wconv_ref:   [K8, Fp]      bf16   conv weight as matmul weight
    bconv_ref:   [1, Fp]       f32
    wfc_ref:     [Fp, NCp]     f32
    bfc_ref:     [1, NCp]      f32
    out_ref:     [BT, NCp]     f32    logits (lane-padded NC)
    acc_ref:     [BT, Fp]      f32    scratch: running post-ReLU spatial SUM
    """
    p = pl.program_id(1)

    @pl.when(p == 0)
    def _init():
        acc_ref[...] = jnp.zeros_like(acc_ref)

    bt = patches_ref.shape[0]
    w = wconv_ref[...]                       # (K8, Fp) bf16
    bias = bconv_ref[...]                    # (1, Fp)  f32

    # Chunk the conv matmul per batch element: caps the live f32 activation
    # intermediate at [THW, Fp] (VMEM-friendly even on v7x), while each matmul
    # is still a large [THW x K8] x [K8 x Fp] MXU op (K contracted on sublanes,
    # HW stays lane-dense).
    for b in range(bt):
        conv = lax.dot_general(
            patches_ref[b], w,                               # (K8,THW)x(K8,Fp)
            dimension_numbers=(((0,), (0,)), ((), ())),
            preferred_element_type=jnp.float32)              # -> (THW, Fp)
        act = jnp.maximum(conv + bias, 0.0)                  # bias + ReLU (f32)
        acc_ref[pl.ds(b, 1), :] = (acc_ref[pl.ds(b, 1), :]
                                   + jnp.sum(act, axis=0, keepdims=True))

    @pl.when(p == pl.num_programs(1) - 1)
    def _finalize():
        acc = acc_ref[...]
        if hw_pad != hw_total:
            # Padded spatial columns are all-zero patches: each contributed
            # exactly relu(bconv) to the sum.  Remove that constant once here
            # instead of masking every spatial tile.
            acc = acc - float(hw_pad - hw_total) * jnp.maximum(bias, 0.0)
        feat = acc * inv_hw                                  # sum -> mean
        logits = jnp.dot(feat, wfc_ref[...],
                         preferred_element_type=jnp.float32) + bfc_ref[...]
        out_ref[...] = logits.astype(out_ref.dtype)          # lane-dense store


def basetl_forward(x_nchw, wconv, bconv, wfc, bfc, *, b_tile=8, hw_tile=512):
    """x_nchw: [B, Cin, H, W] f32 (NCHW); wconv: [F, Cin, 3, 3]; bconv: [F];
    wfc: [NC, F] (nn.Linear layout); bfc: [NC].  Returns [B, NC] f32 logits."""
    B, Cin, H, W = x_nchw.shape
    F = wconv.shape[0]
    NC = wfc.shape[0]
    HW = H * W
    K = 9 * Cin

    # ---- padded / tiled sizes ------------------------------------------------
    K8 = _round_up(K, 8)               # sublane alignment only (no 128 padding)
    Fp = _round_up(F, 256) if F >= 256 else _round_up(F, 128)   # full MXU width
    NCp = _round_up(NC, 128)

    b_cap = _round_up(B, 8)
    BT = min(_round_up(b_tile, 8), b_cap)
    if b_cap // BT < 2 and b_cap >= 16:
        BT = max(8, (b_cap // 2) // 8 * 8)   # >=2 parallel tiles for v7x 2nd TC
    Bp = _round_up(B, BT)

    THW = min(_round_up(hw_tile, 128), _round_up(HW, 128))      # lane-aligned
    HWp = _round_up(HW, THW)

    # ---- im2col glue (bf16, K-major [B, K, HW], no NHWC transpose) -----------
    # TODO(synk): im2col still duplicates the input 9x in HBM; eliminating it
    # needs an in-kernel halo'd row-band DMA (memory_space=pl.ANY +
    # make_async_copy) that plain BlockSpecs cannot express.
    x_bf = x_nchw.astype(jnp.bfloat16)
    xpad = jnp.pad(x_bf, ((0, 0), (0, 0), (1, 1), (1, 1)))
    taps = [xpad[:, :, kh:kh + H, kw:kw + W].reshape(B, Cin, HW)
            for kh in range(3) for kw in range(3)]
    patches = jnp.concatenate(taps, axis=1)                     # [B, K, HW] bf16
    if (Bp, K8, HWp) != (B, K, HW):
        patches = jnp.pad(patches, ((0, Bp - B), (0, K8 - K), (0, HWp - HW)))

    # Conv weight -> [K8, Fp] matmul weight matching the (kh, kw, c) tap order.
    w_mat = jnp.transpose(wconv, (2, 3, 1, 0)).reshape(K, F)
    w_mat = jnp.pad(w_mat, ((0, K8 - K), (0, Fp - F))).astype(jnp.bfloat16)
    b_mat = jnp.pad(bconv.reshape(1, F), ((0, 0), (0, Fp - F))).astype(jnp.float32)
    wfc_mat = jnp.pad(jnp.transpose(wfc),
                      ((0, Fp - F), (0, NCp - NC))).astype(jnp.float32)
    bfc_mat = jnp.pad(bfc.reshape(1, NC),
                      ((0, 0), (0, NCp - NC))).astype(jnp.float32)

    grid = (Bp // BT, HWp // THW)    # (parallel batch tiles, arbitrary HW tiles)
    kernel = functools.partial(_basetl_kernel, hw_total=HW, hw_pad=HWp,
                               inv_hw=1.0 / HW)

    # ---- VMEM budget derived from the actual tile footprint ------------------
    patch_block = BT * K8 * THW * 2                       # bf16, double-buffered
    const_blocks = (K8 * Fp * 2) + (8 * Fp * 4) + (Fp * NCp * 4) + (8 * NCp * 4)
    out_block = BT * NCp * 4
    act_chunk = THW * Fp * 4                              # one live f32 chunk
    footprint = (2 * patch_block + 2 * const_blocks + 2 * out_block
                 + BT * Fp * 4 + 2 * act_chunk)
    vmem_limit = int(min(max(footprint + (4 << 20), 8 << 20), _vmem_cap_bytes()))

    flops = 2.0 * Bp * HWp * K8 * Fp + 2.0 * Bp * Fp * NCp
    bytes_accessed = (patches.size * 2 + w_mat.size * 2
                      + (b_mat.size + wfc_mat.size + bfc_mat.size) * 4
                      + Bp * NCp * 4)

    out = pl.pallas_call(
        kernel,
        out_shape=jax.ShapeDtypeStruct((Bp, NCp), jnp.float32),
        grid_spec=pltpu.PrefetchScalarGridSpec(
            num_scalar_prefetch=0,
            grid=grid,
            in_specs=[
                # Streamed operand: K-major patches, HW (lane axis) is tiled.
                pl.BlockSpec((BT, K8, THW), lambda b, p: (b, 0, p)),
                # Constant operands: index map is (0, 0) every step, so the
                # pipeline fetches them once (no per-step re-DMA).
                pl.BlockSpec((K8, Fp), lambda b, p: (0, 0)),
                pl.BlockSpec((1, Fp), lambda b, p: (0, 0)),
                pl.BlockSpec((Fp, NCp), lambda b, p: (0, 0)),
                pl.BlockSpec((1, NCp), lambda b, p: (0, 0)),
            ],
            out_specs=pl.BlockSpec((BT, NCp), lambda b, p: (b, 0)),
            scratch_shapes=[pltpu.VMEM((BT, Fp), jnp.float32)],
        ),
        compiler_params=pltpu.CompilerParams(
            dimension_semantics=("parallel", "arbitrary"),
            vmem_limit_bytes=vmem_limit,
        ),
        cost_estimate=pl.CostEstimate(
            flops=int(flops), transcendentals=0,
            bytes_accessed=int(bytes_accessed)),
    )(patches, w_mat, b_mat, wfc_mat, bfc_mat)

    return out[:B, :NC]


def _reference_forward(x_nchw, wconv, bconv, wfc, bfc):
    """Pure-JAX f32 reference (matches PyTorch semantics)."""
    conv = lax.conv_general_dilated(
        x_nchw, wconv, window_strides=(1, 1), padding="SAME",
        dimension_numbers=("NCHW", "OIHW", "NCHW"),
    ) + bconv[None, :, None, None]
    act = jnp.maximum(conv, 0.0)
    feat = jnp.mean(act, axis=(2, 3))
    return feat @ wfc.T + bfc[None, :]


if __name__ == "__main__":
    # Small deterministic synthetic shapes.
    B, Cin, H, W = 2, 4, 16, 16
    feat_dim = 32          # stand-in for base_network.feat_dim
    num_classes = 8        # fcn output width

    key = jax.random.PRNGKey(0)
    kx, kw1, kb1, kw2, kb2 = jax.random.split(key, 5)
    x = jax.random.normal(kx, (B, Cin, H, W), dtype=jnp.float32)
    wconv = jax.random.normal(kw1, (feat_dim, Cin, 3, 3), dtype=jnp.float32) * 0.1
    bconv = jax.random.normal(kb1, (feat_dim,), dtype=jnp.float32) * 0.1
    wfc = jax.random.normal(kw2, (num_classes, feat_dim), dtype=jnp.float32) * 0.1
    bfc = jax.random.normal(kb2, (num_classes,), dtype=jnp.float32) * 0.1

    out = jax.block_until_ready(basetl_forward(x, wconv, bconv, wfc, bfc))
    ref = _reference_forward(x, wconv, bconv, wfc, bfc)

    assert out.shape == (B, num_classes)
    # Conv matmul operands are bf16 (f32 accumulation) -> bf16-level tolerance.
    assert jnp.allclose(out, ref, atol=2e-2, rtol=2e-2), "mismatch vs JAX reference"

    # TODO(synk): mixup / optimizer / checkpointing / traced_model from BaseTL
    # are training-time / serialization utilities with no kernel equivalent;
    # only the forward pass is implemented.
    print("KERNEL_OK")
</pallas_src>

<mosaic_0001>
module attributes {stable_mosaic.version = 11 : i64} {
  func.func @_basetl_kernel(%arg0: i32, %arg1: i32, %arg2: memref<8x40x256xbf16, #tpu.memory_space<vmem>>, %arg3: memref<40x128xbf16, #tpu.memory_space<vmem>>, %arg4: memref<1x128xf32, #tpu.memory_space<vmem>>, %arg5: memref<128x128xf32, #tpu.memory_space<vmem>>, %arg6: memref<1x128xf32, #tpu.memory_space<vmem>>, %arg7: memref<8x128xf32, #tpu.memory_space<vmem>>, %arg8: memref<8x128xf32, #tpu.memory_space<vmem>>) attributes {dimension_semantics = [#tpu.dimension_semantics<parallel>, #tpu.dimension_semantics<arbitrary>], iteration_bounds = array<i64: 1, 1>, scalar_prefetch = 0 : i64, scratch_operands = 1 : i64, tpu.core_type = #tpu.core_type<tc>, window_params = [{transform_indices = @transform_0, window_bounds = array<i64: 8, 40, 256>}, {pipeline_mode = #tpu.pipeline_mode<synchronous>, transform_indices = @transform_1, window_bounds = array<i64: 40, 128>}, {pipeline_mode = #tpu.pipeline_mode<synchronous>, transform_indices = @transform_2, window_bounds = array<i64: 1, 128>}, {pipeline_mode = #tpu.pipeline_mode<synchronous>, transform_indices = @transform_3, window_bounds = array<i64: 128, 128>}, {pipeline_mode = #tpu.pipeline_mode<synchronous>, transform_indices = @transform_4, window_bounds = array<i64: 1, 128>}, {transform_indices = @transform_5, window_bounds = array<i64: 8, 128>}]} {
    %c0_i32 = arith.constant 0 : i32
    %0 = arith.cmpi eq, %arg1, %c0_i32 : i32
    %1 = arith.extui %0 : i1 to i32
    %c0_i32_0 = arith.constant 0 : i32
    %2 = arith.cmpi ne, %1, %c0_i32_0 : i32
    scf.if %2 {
      %cst_78 = arith.constant 0.000000e+00 : f32
      %104 = vector.broadcast %cst_78 : f32 to vector<8x128xf32>
      %c0_79 = arith.constant 0 : index
      %c0_80 = arith.constant 0 : index
      %105 = vector.load %arg8[%c0_79, %c0_80] : memref<8x128xf32, #tpu.memory_space<vmem>>, vector<8x128xf32>
      tpu.vector_store %arg8[%c0_79, %c0_80], %104 {strides = array<i32>} : memref<8x128xf32, #tpu.memory_space<vmem>>, vector<8x128xf32>,
    } else {
    }
    %c0 = arith.constant 0 : index
    %c0_1 = arith.constant 0 : index
    %3 = vector.load %arg3[%c0, %c0_1] : memref<40x128xbf16, #tpu.memory_space<vmem>>, vector<40x128xbf16>
    %c0_2 = arith.constant 0 : index
    %c0_3 = arith.constant 0 : index
    %4 = vector.load %arg4[%c0_2, %c0_3] : memref<1x128xf32, #tpu.memory_space<vmem>>, vector<1x128xf32>
    %c0_4 = arith.constant 0 : index
    %c0_5 = arith.constant 0 : index
    %c0_6 = arith.constant 0 : index
    %5 = vector.load %arg2[%c0_4, %c0_5, %c0_6] : memref<8x40x256xbf16, #tpu.memory_space<vmem>>, vector<1x40x256xbf16>
    %6 = vector.shape_cast %5 : vector<1x40x256xbf16> to vector<40x256xbf16>
    %cst = arith.constant dense<0.000000e+00> : vector<256x128xf32>
    %7 = tpu.matmul %6, %3, %cst {dimension_numbers = #tpu.dot_dimension_numbers<[0], [0], [1], [1], [0, 1, 1, 1], [], []>} : vector<40x256xbf16>, vector<40x128xbf16>, vector<256x128xf32> -> vector<256x128xf32>
    %8 = vector.broadcast %4 : vector<1x128xf32> to vector<256x128xf32>
    %9 = arith.addf %7, %8 : vector<256x128xf32>
    %cst_7 = arith.constant 0.000000e+00 : f32
    %10 = vector.broadcast %cst_7 : f32 to vector<256x128xf32>
    %11 = arith.maximumf %9, %10 : vector<256x128xf32>
    %c0_8 = arith.constant 0 : index
    %c0_9 = arith.constant 0 : index
    %12 = vector.load %arg8[%c0_8, %c0_9] : memref<8x128xf32, #tpu.memory_space<vmem>>, vector<1x128xf32>
    %cst_10 = arith.constant dense<0.000000e+00> : vector<128xf32>
    %13 = vector.multi_reduction <add>, %11, %cst_10 [0] : vector<256x128xf32> to vector<128xf32>
    %14 = vector.shape_cast %13 : vector<128xf32> to vector<1x128xf32>
    %15 = arith.addf %12, %14 : vector<1x128xf32>
    %c0_11 = arith.constant 0 : index
    %c0_12 = arith.constant 0 : index
    %16 = vector.load %arg8[%c0_11, %c0_12] : memref<8x128xf32, #tpu.memory_space<vmem>>, vector<1x128xf32>
    tpu.vector_store %arg8[%c0_11, %c0_12], %15 {strides = array<i32>} : memref<8x128xf32, #tpu.memory_space<vmem>>, vector<1x128xf32>,
    %c1 = arith.constant 1 : index
    %c0_13 = arith.constant 0 : index
    %c0_14 = arith.constant 0 : index
    %17 = vector.load %arg2[%c1, %c0_13, %c0_14] : memref<8x40x256xbf16, #tpu.memory_space<vmem>>, vector<1x40x256xbf16>
    %18 = vector.shape_cast %17 : vector<1x40x256xbf16> to vector<40x256xbf16>
    %cst_15 = arith.constant dense<0.000000e+00> : vector<256x128xf32>
    %19 = tpu.matmul %18, %3, %cst_15 {dimension_numbers = #tpu.dot_dimension_numbers<[0], [0], [1], [1], [0, 1, 1, 1], [], []>} : vector<40x256xbf16>, vector<40x128xbf16>, vector<256x128xf32> -> vector<256x128xf32>
    %20 = vector.broadcast %4 : vector<1x128xf32> to vector<256x128xf32>
    %21 = arith.addf %19, %20 : vector<256x128xf32>
    %cst_16 = arith.constant 0.000000e+00 : f32
    %22 = vector.broadcast %cst_16 : f32 to vector<256x128xf32>
    %23 = arith.maximumf %21, %22 : vector<256x128xf32>
    %c1_17 = arith.constant 1 : index
    %c0_18 = arith.constant 0 : index
    %24 = vector.load %arg8[%c1_17, %c0_18] : memref<8x128xf32, #tpu.memory_space<vmem>>, vector<1x128xf32>
    %cst_19 = arith.constant dense<0.000000e+00> : vector<128xf32>
    %25 = vector.multi_reduction <add>, %23, %cst_19 [0] : vector<256x128xf32> to vector<128xf32>
    %26 = vector.shape_cast %25 : vector<128xf32> to vector<1x128xf32>
    %27 = arith.addf %24, %26 : vector<1x128xf32>
    %c1_20 = arith.constant 1 : index
    %c0_21 = arith.constant 0 : index
    %28 = vector.load %arg8[%c1_20, %c0_21] : memref<8x128xf32, #tpu.memory_space<vmem>>, vector<1x128xf32>
    tpu.vector_store %arg8[%c1_20, %c0_21], %27 {strides = array<i32>} : memref<8x128xf32, #tpu.memory_space<vmem>>, vector<1x128xf32>,
    %c2 = arith.constant 2 : index
    %c0_22 = arith.constant 0 : index
    %c0_23 = arith.constant 0 : index
    %29 = vector.load %arg2[%c2, %c0_22, %c0_23] : memref<8x40x256xbf16, #tpu.memory_space<vmem>>, vector<1x40x256xbf16>
    %30 = vector.shape_cast %29 : vector<1x40x256xbf16> to vector<40x256xbf16>
    %cst_24 = arith.constant dense<0.000000e+00> : vector<256x128xf32>
    %31 = tpu.matmul %30, %3, %cst_24 {dimension_numbers = #tpu.dot_dimension_numbers<[0], [0], [1], [1], [0, 1, 1, 1], [], []>} : vector<40x256xbf16>, vector<40x128xbf16>, vector<256x128xf32> -> vector<256x128xf32>
    %32 = vector.broadcast %4 : vector<1x128xf32> to vector<256x128xf32>
    %33 = arith.addf %31, %32 : vector<256x128xf32>
    %cst_25 = arith.constant 0.000000e+00 : f32
    %34 = vector.broadcast %cst_25 : f32 to vector<256x128xf32>
    %35 = arith.maximumf %33, %34 : vector<256x128xf32>
    %c2_26 = arith.constant 2 : index
    %c0_27 = arith.constant 0 : index
    %36 = vector.load %arg8[%c2_26, %c0_27] : memref<8x128xf32, #tpu.memory_space<vmem>>, vector<1x128xf32>
    %cst_28 = arith.constant dense<0.000000e+00> : vector<128xf32>
    %37 = vector.multi_reduction <add>, %35, %cst_28 [0] : vector<256x128xf32> to vector<128xf32>
    %38 = vector.shape_cast %37 : vector<128xf32> to vector<1x128xf32>
    %39 = arith.addf %36, %38 : vector<1x128xf32>
    %c2_29 = arith.constant 2 : index
    %c0_30 = arith.constant 0 : index
    %40 = vector.load %arg8[%c2_29, %c0_30] : memref<8x128xf32, #tpu.memory_space<vmem>>, vector<1x128xf32>
    tpu.vector_store %arg8[%c2_29, %c0_30], %39 {strides = array<i32>} : memref<8x128xf32, #tpu.memory_space<vmem>>, vector<1x128xf32>,
    %c3 = arith.constant 3 : index
    %c0_31 = arith.constant 0 : index
    %c0_32 = arith.constant 0 : index
    %41 = vector.load %arg2[%c3, %c0_31, %c0_32] : memref<8x40x256xbf16, #tpu.memory_space<vmem>>, vector<1x40x256xbf16>
    %42 = vector.shape_cast %41 : vector<1x40x256xbf16> to vector<40x256xbf16>
    %cst_33 = arith.constant dense<0.000000e+00> : vector<256x128xf32>
    %43 = tpu.matmul %42, %3, %cst_33 {dimension_numbers = #tpu.dot_dimension_numbers<[0], [0], [1], [1], [0, 1, 1, 1], [], []>} : vector<40x256xbf16>, vector<40x128xbf16>, vector<256x128xf32> -> vector<256x128xf32>
    %44 = vector.broadcast %4 : vector<1x128xf32> to vector<256x128xf32>
    %45 = arith.addf %43, %44 : vector<256x128xf32>
    %cst_34 = arith.constant 0.000000e+00 : f32
    %46 = vector.broadcast %cst_34 : f32 to vector<256x128xf32>
    %47 = arith.maximumf %45, %46 : vector<256x128xf32>
    %c3_35 = arith.constant 3 : index
    %c0_36 = arith.constant 0 : index
    %48 = vector.load %arg8[%c3_35, %c0_36] : memref<8x128xf32, #tpu.memory_space<vmem>>, vector<1x128xf32>
    %cst_37 = arith.constant dense<0.000000e+00> : vector<128xf32>
    %49 = vector.multi_reduction <add>, %47, %cst_37 [0] : vector<256x128xf32> to vector<128xf32>
    %50 = vector.shape_cast %49 : vector<128xf32> to vector<1x128xf32>
    %51 = arith.addf %48, %50 : vector<1x128xf32>
    %c3_38 = arith.constant 3 : index
    %c0_39 = arith.constant 0 : index
    %52 = vector.load %arg8[%c3_38, %c0_39] : memref<8x128xf32, #tpu.memory_space<vmem>>, vector<1x128xf32>
    tpu.vector_store %arg8[%c3_38, %c0_39], %51 {strides = array<i32>} : memref<8x128xf32, #tpu.memory_space<vmem>>, vector<1x128xf32>,
    %c4 = arith.constant 4 : index
    %c0_40 = arith.constant 0 : index
    %c0_41 = arith.constant 0 : index
    %53 = vector.load %arg2[%c4, %c0_40, %c0_41] : memref<8x40x256xbf16, #tpu.memory_space<vmem>>, vector<1x40x256xbf16>
    %54 = vector.shape_cast %53 : vector<1x40x256xbf16> to vector<40x256xbf16>
    %cst_42 = arith.constant dense<0.000000e+00> : vector<256x128xf32>
    %55 = tpu.matmul %54, %3, %cst_42 {dimension_numbers = #tpu.dot_dimension_numbers<[0], [0], [1], [1], [0, 1, 1, 1], [], []>} : vector<40x256xbf16>, vector<40x128xbf16>, vector<256x128xf32> -> vector<256x128xf32>
    %56 = vector.broadcast %4 : vector<1x128xf32> to vector<256x128xf32>
    %57 = arith.addf %55, %56 : vector<256x128xf32>
    %cst_43 = arith.constant 0.000000e+00 : f32
    %58 = vector.broadcast %cst_43 : f32 to vector<256x128xf32>
    %59 = arith.maximumf %57, %58 : vector<256x128xf32>
    %c4_44 = arith.constant 4 : index
    %c0_45 = arith.constant 0 : index
    %60 = vector.load %arg8[%c4_44, %c0_45] : memref<8x128xf32, #tpu.memory_space<vmem>>, vector<1x128xf32>
    %cst_46 = arith.constant dense<0.000000e+00> : vector<128xf32>
    %61 = vector.multi_reduction <add>, %59, %cst_46 [0] : vector<256x128xf32> to vector<128xf32>
    %62 = vector.shape_cast %61 : vector<128xf32> to vector<1x128xf32>
    %63 = arith.addf %60, %62 : vector<1x128xf32>
    %c4_47 = arith.constant 4 : index
    %c0_48 = arith.constant 0 : index
    %64 = vector.load %arg8[%c4_47, %c0_48] : memref<8x128xf32, #tpu.memory_space<vmem>>, vector<1x128xf32>
    tpu.vector_store %arg8[%c4_47, %c0_48], %63 {strides = array<i32>} : memref<8x128xf32, #tpu.memory_space<vmem>>, vector<1x128xf32>,
    %c5 = arith.constant 5 : index
    %c0_49 = arith.constant 0 : index
    %c0_50 = arith.constant 0 : index
    %65 = vector.load %arg2[%c5, %c0_49, %c0_50] : memref<8x40x256xbf16, #tpu.memory_space<vmem>>, vector<1x40x256xbf16>
    %66 = vector.shape_cast %65 : vector<1x40x256xbf16> to vector<40x256xbf16>
    %cst_51 = arith.constant dense<0.000000e+00> : vector<256x128xf32>
    %67 = tpu.matmul %66, %3, %cst_51 {dimension_numbers = #tpu.dot_dimension_numbers<[0], [0], [1], [1], [0, 1, 1, 1], [], []>} : vector<40x256xbf16>, vector<40x128xbf16>, vector<256x128xf32> -> vector<256x128xf32>
    %68 = vector.broadcast %4 : vector<1x128xf32> to vector<256x128xf32>
    %69 = arith.addf %67, %68 : vector<256x128xf32>
    %cst_52 = arith.constant 0.000000e+00 : f32
    %70 = vector.broadcast %cst_52 : f32 to vector<256x128xf32>
    %71 = arith.maximumf %69, %70 : vector<256x128xf32>
    %c5_53 = arith.constant 5 : index
    %c0_54 = arith.constant 0 : index
    %72 = vector.load %arg8[%c5_53, %c0_54] : memref<8x128xf32, #tpu.memory_space<vmem>>, vector<1x128xf32>
    %cst_55 = arith.constant dense<0.000000e+00> : vector<128xf32>
    %73 = vector.multi_reduction <add>, %71, %cst_55 [0] : vector<256x128xf32> to vector<128xf32>
    %74 = vector.shape_cast %73 : vector<128xf32> to vector<1x128xf32>
    %75 = arith.addf %72, %74 : vector<1x128xf32>
    %c5_56 = arith.constant 5 : index
    %c0_57 = arith.constant 0 : index
    %76 = vector.load %arg8[%c5_56, %c0_57] : memref<8x128xf32, #tpu.memory_space<vmem>>, vector<1x128xf32>
    tpu.vector_store %arg8[%c5_56, %c0_57], %75 {strides = array<i32>} : memref<8x128xf32, #tpu.memory_space<vmem>>, vector<1x128xf32>,
    %c6 = arith.constant 6 : index
    %c0_58 = arith.constant 0 : index
    %c0_59 = arith.constant 0 : index
    %77 = vector.load %arg2[%c6, %c0_58, %c0_59] : memref<8x40x256xbf16, #tpu.memory_space<vmem>>, vector<1x40x256xbf16>
    %78 = vector.shape_cast %77 : vector<1x40x256xbf16> to vector<40x256xbf16>
    %cst_60 = arith.constant dense<0.000000e+00> : vector<256x128xf32>
    %79 = tpu.matmul %78, %3, %cst_60 {dimension_numbers = #tpu.dot_dimension_numbers<[0], [0], [1], [1], [0, 1, 1, 1], [], []>} : vector<40x256xbf16>, vector<40x128xbf16>, vector<256x128xf32> -> vector<256x128xf32>
    %80 = vector.broadcast %4 : vector<1x128xf32> to vector<256x128xf32>
    %81 = arith.addf %79, %80 : vector<256x128xf32>
    %cst_61 = arith.constant 0.000000e+00 : f32
    %82 = vector.broadcast %cst_61 : f32 to vector<256x128xf32>
    %83 = arith.maximumf %81, %82 : vector<256x128xf32>
    %c6_62 = arith.constant 6 : index
    %c0_63 = arith.constant 0 : index
    %84 = vector.load %arg8[%c6_62, %c0_63] : memref<8x128xf32, #tpu.memory_space<vmem>>, vector<1x128xf32>
    %cst_64 = arith.constant dense<0.000000e+00> : vector<128xf32>
    %85 = vector.multi_reduction <add>, %83, %cst_64 [0] : vector<256x128xf32> to vector<128xf32>
    %86 = vector.shape_cast %85 : vector<128xf32> to vector<1x128xf32>
    %87 = arith.addf %84, %86 : vector<1x128xf32>
    %c6_65 = arith.constant 6 : index
    %c0_66 = arith.constant 0 : index
    %88 = vector.load %arg8[%c6_65, %c0_66] : memref<8x128xf32, #tpu.memory_space<vmem>>, vector<1x128xf32>
    tpu.vector_store %arg8[%c6_65, %c0_66], %87 {strides = array<i32>} : memref<8x128xf32, #tpu.memory_space<vmem>>, vector<1x128xf32>,
    %c7 = arith.constant 7 : index
    %c0_67 = arith.constant 0 : index
    %c0_68 = arith.constant 0 : index
    %89 = vector.load %arg2[%c7, %c0_67, %c0_68] : memref<8x40x256xbf16, #tpu.memory_space<vmem>>, vector<1x40x256xbf16>
    %90 = vector.shape_cast %89 : vector<1x40x256xbf16> to vector<40x256xbf16>
    %cst_69 = arith.constant dense<0.000000e+00> : vector<256x128xf32>
    %91 = tpu.matmul %90, %3, %cst_69 {dimension_numbers = #tpu.dot_dimension_numbers<[0], [0], [1], [1], [0, 1, 1, 1], [], []>} : vector<40x256xbf16>, vector<40x128xbf16>, vector<256x128xf32> -> vector<256x128xf32>
    %92 = vector.broadcast %4 : vector<1x128xf32> to vector<256x128xf32>
    %93 = arith.addf %91, %92 : vector<256x128xf32>
    %cst_70 = arith.constant 0.000000e+00 : f32
    %94 = vector.broadcast %cst_70 : f32 to vector<256x128xf32>
    %95 = arith.maximumf %93, %94 : vector<256x128xf32>
    %c7_71 = arith.constant 7 : index
    %c0_72 = arith.constant 0 : index
    %96 = vector.load %arg8[%c7_71, %c0_72] : memref<8x128xf32, #tpu.memory_space<vmem>>, vector<1x128xf32>
    %cst_73 = arith.constant dense<0.000000e+00> : vector<128xf32>
    %97 = vector.multi_reduction <add>, %95, %cst_73 [0] : vector<256x128xf32> to vector<128xf32>
    %98 = vector.shape_cast %97 : vector<128xf32> to vector<1x128xf32>
    %99 = arith.addf %96, %98 : vector<1x128xf32>
    %c7_74 = arith.constant 7 : index
    %c0_75 = arith.constant 0 : index
    %100 = vector.load %arg8[%c7_74, %c0_75] : memref<8x128xf32, #tpu.memory_space<vmem>>, vector<1x128xf32>
    tpu.vector_store %arg8[%c7_74, %c0_75], %99 {strides = array<i32>} : memref<8x128xf32, #tpu.memory_space<vmem>>, vector<1x128xf32>,
    %c0_i32_76 = arith.constant 0 : i32
    %101 = arith.cmpi eq, %arg1, %c0_i32_76 : i32
    %102 = arith.extui %101 : i1 to i32
    %c0_i32_77 = arith.constant 0 : i32
    %103 = arith.cmpi ne, %102, %c0_i32_77 : i32
    scf.if %103 {
      %c0_78 = arith.constant 0 : index
      %c0_79 = arith.constant 0 : index
      %104 = vector.load %arg8[%c0_78, %c0_79] : memref<8x128xf32, #tpu.memory_space<vmem>>, vector<8x128xf32>
      %cst_80 = arith.constant 3.906250e-03 : f32
      %105 = vector.broadcast %cst_80 : f32 to vector<8x128xf32>
      %106 = arith.mulf %104, %105 : vector<8x128xf32>
      %c0_81 = arith.constant 0 : index
      %c0_82 = arith.constant 0 : index
      %107 = vector.load %arg5[%c0_81, %c0_82] : memref<128x128xf32, #tpu.memory_space<vmem>>, vector<128x128xf32>
      %cst_83 = arith.constant dense<0.000000e+00> : vector<8x128xf32>
      %108 = tpu.matmul %106, %107, %cst_83 {dimension_numbers = #tpu.dot_dimension_numbers<[1], [0], [0], [1], [0, 0, 1, 1], [], []>} : vector<8x128xf32>, vector<128x128xf32>, vector<8x128xf32> -> vector<8x128xf32>
      %c0_84 = arith.constant 0 : index
      %c0_85 = arith.constant 0 : index
      %109 = vector.load %arg6[%c0_84, %c0_85] : memref<1x128xf32, #tpu.memory_space<vmem>>, vector<1x128xf32>
      %110 = vector.broadcast %109 : vector<1x128xf32> to vector<8x128xf32>
      %111 = arith.addf %108, %110 : vector<8x128xf32>
      %c0_86 = arith.constant 0 : index
      %c0_87 = arith.constant 0 : index
      %112 = vector.load %arg7[%c0_86, %c0_87] : memref<8x128xf32, #tpu.memory_space<vmem>>, vector<8x128xf32>
      tpu.vector_store %arg7[%c0_86, %c0_87], %111 {strides = array<i32>} : memref<8x128xf32, #tpu.memory_space<vmem>>, vector<8x128xf32>,
    } else {
    }
    return
  }
  func.func @transform_0(%arg0: i32, %arg1: i32) -> (i32, i32, i32) {
    %c0_i32 = arith.constant 0 : i32
    %c0_i32_0 = arith.constant 0 : i32
    return %arg0, %c0_i32, %arg1 : i32, i32, i32
  }
  func.func @transform_1(%arg0: i32, %arg1: i32) -> (i32, i32) {
    %c0_i32 = arith.constant 0 : i32
    %c0_i32_0 = arith.constant 0 : i32
    %c0_i32_1 = arith.constant 0 : i32
    return %c0_i32, %c0_i32_0 : i32, i32
  }
  func.func @transform_2(%arg0: i32, %arg1: i32) -> (i32, i32) {
    %c0_i32 = arith.constant 0 : i32
    %c0_i32_0 = arith.constant 0 : i32
    %c0_i32_1 = arith.constant 0 : i32
    return %c0_i32, %c0_i32_0 : i32, i32
  }
  func.func @transform_3(%arg0: i32, %arg1: i32) -> (i32, i32) {
    %c0_i32 = arith.constant 0 : i32
    %c0_i32_0 = arith.constant 0 : i32
    %c0_i32_1 = arith.constant 0 : i32
    return %c0_i32, %c0_i32_0 : i32, i32
  }
  func.func @transform_4(%arg0: i32, %arg1: i32) -> (i32, i32) {
    %c0_i32 = arith.constant 0 : i32
    %c0_i32_0 = arith.constant 0 : i32
    %c0_i32_1 = arith.constant 0 : i32
    return %c0_i32, %c0_i32_0 : i32, i32
  }
  func.func @transform_5(%arg0: i32, %arg1: i32) -> (i32, i32) {
    %c0_i32 = arith.constant 0 : i32
    %c0_i32_0 = arith.constant 0 : i32
    return %arg0, %c0_i32 : i32, i32
  }
}

</mosaic_0001>

<bundles_post_ra>
// kernel: tpu_custom_call.1
= control target key start
LH: loop header
LB: loop body
LE: loop exit
PB: predicated region body
PF: predicated region fallthrough
CT: control target
= control target key end

     0   :  { %10 = vsyncpa [#allocation4], 0  ;;  %s3491_s0 = inlined_call_operand.hbm [shape: bf16[8,40,256], index: 0, kind: input, shape index: {}]   ;;  %s3492_s1 = inlined_call_operand.hbm [shape: bf16[40,128], index: 1, kind: input, shape index: {}]   ;;  %s3493_s2 = inlined_call_operand.vmem [shape: f32[1,128], index: 2, kind: input, shape index: {}]   ;;  %s3494_s3 = inlined_call_operand.hbm [shape: f32[128,128], index: 3, kind: input, shape index: {}]   ;;  %s3495_s4 = inlined_call_operand.vmem [shape: f32[1,128], index: 4, kind: input, shape index: {}]   ;;  %s3496_s5 = inlined_call_operand.hbm [shape: f32[8,128], index: 5, kind: output, shape index: {}]  }
   0x1   :  { %11 = vsyncpa [#allocation7], 0  ;;  %s30_s20 = sshll.u32 %s3492_s1, 4  ;;  %s31_s20 = int_to_ptr.hbm [resolvable:$true] %s30_s20 }
   0x2   :  { %12 = vsyncpa [#allocation5], 0  ;;  %s2708_s21 = smov [#allocation6]   ;;  %s17_s25 = sshll.u32 %s3491_s0, 4  ;;  %s18_s25 = int_to_ptr.hbm [resolvable:$true] %s17_s25 }
   0x3   :  { %s32_s22 = sshll.u32 %s2708_s21, 4  ;;  %s2709_s26 = smov 64   ;;  %s33_s22 = int_to_ptr.vmem [resolvable:$true] %s32_s22 }
   0x4   :  { %s2710_s27 = smov 4   ;;  %s2711_s28 = smov [#allocation3]  }
   0x5   :  { %38 = dma.hbm_to_vmem [thread:$0]  %s31_s20, 320, %s33_s22, [#allocation7], %s2709_s26, %s2709_s26, %s2710_s27  }
   0x6   :  { %s19_s29 = sshll.u32 %s2711_s28, 4  ;;  %s2712_s30 = smov 128   ;;  %s20_s29 = int_to_ptr.vmem [resolvable:$true] %s19_s29 }
   0x7   :  { %s2713_s6 = smov 8   ;;  %s45_s8 = sshll.u32 %s3494_s3, 4  ;;  %s46_s8 = int_to_ptr.hbm [resolvable:$true] %s45_s8 }
   0x8   :  { %25 = dma.hbm_to_vmem [thread:$0]  %s18_s25, 5120, %s20_s29, [#allocation4], %s2712_s30, %s2712_s30, %s2713_s6  }
   0x9   :  { %s2714_s9 = smov [#allocation8]  }
   0xa   :  { %s47_s10 = sshll.u32 %s2714_s9, 4  ;;  %s48_s10 = int_to_ptr.vmem [resolvable:$true] %s47_s10 }
   0xb   :  { %53 = dma.hbm_to_vmem [thread:$0]  %s46_s8, 2048, %s48_s10, [#allocation7], %s2712_s30, %s2712_s30, %s2713_s6  }
   0xc   :  { %2702 = dma.done.wait [#allocation4], 5120  }
   0xd   :  { %2703 = vsyncadd [#allocation4], 4294962176 }
   0xe   :  { %2704 = dma.done.wait [#allocation7], 2368  }
   0xf   :  { %2705 = vsyncadd [#allocation7], 4294964928  ;;  %v2572_v0 = vld [vmem:[#allocation3 + $0x7c] sm:$0xf]  ;;  %v2400_v1 = vld [vmem:[#allocation3 + $0x78] sm:$0xf] }
  0x10   :  { %v2402_v2 = vld [vmem:[#allocation3 + $0x80] sm:$0xf0]  ;;  %v2573_v3 = vld [vmem:[#allocation3 + $0x7c] sm:$0xf0]  ;;  %v2568_v6 = vld [vmem:[#allocation3 + $0x54] sm:$0xf] }
  0x11   :  { %v2401_v4 = vor.u32 %v2573_v3, %v2400_v1  ;;  %v2405_v5 = vor.u32 %v2572_v0, %v2402_v2  ;;  %v2368_v7 = vld [vmem:[#allocation3 + $0x50] sm:$0xf]  ;;  %v2370_v8 = vld [vmem:[#allocation3 + $0x58] sm:$0xf0]  ;;  %v2569_v9 = vld [vmem:[#allocation3 + $0x54] sm:$0xf0] }
  0x12   :  { %v2373_v10 = vor.u32 %v2568_v6, %v2370_v8  ;;  %v2560_v11 = vld [vmem:[#allocation3 + $0x4] sm:$0xf]  ;;  %v2296_v12 = vld [vmem:[#allocation3] sm:$0xf]  ;;  %v2369_v13 = vor.u32 %v2569_v9, %v2368_v7  ;;  %v2298_v14 = vld [vmem:[#allocation3 + $0x8] sm:$0xf0] }
  0x13   :  { %933 = vxpose.binary.xlu1.c.b16.start [1/6] (short) %v2405_v5, %v2401_v4, 128  ;;  %v2561_v15 = vld [vmem:[#allocation3 + $0x4] sm:$0xf0]  ;;  %v2301_v17 = vor.u32 %v2560_v11, %v2298_v14  ;;  %v2574_v18 = vld [vmem:[#allocation3 + $0x8c] sm:$0xf]  ;;  %v2410_v20 = vld [vmem:[#allocation3 + $0x90] sm:$0xf0] }
  0x14   :  { %v2297_v16 = vor.u32 %v2561_v15, %v2296_v12  ;;  %667 = vxpose.binary.xlu0.c.b16.start [1/6] (short) %v2373_v10, %v2369_v13, 128  ;;  %v2408_v19 = vld [vmem:[#allocation3 + $0x88] sm:$0xf]  ;;  %v2575_v21 = vld [vmem:[#allocation3 + $0x8c] sm:$0xf0]  ;;  %v2570_v22 = vld [vmem:[#allocation3 + $0x64] sm:$0xf]  ;;  %v2413_v28 = vor.u32 %v2574_v18, %v2410_v20 }
  0x15   :  { %v2376_v23 = vld [vmem:[#allocation3 + $0x60] sm:$0xf]  ;;  %v2378_v24 = vld [vmem:[#allocation3 + $0x68] sm:$0xf0]  ;;  %v2571_v25 = vld [vmem:[#allocation3 + $0x64] sm:$0xf0]  ;;  %v2409_v27 = vor.u32 %v2575_v21, %v2408_v19 }
  0x16   :  { %115 = vxpose.binary.xlu2.c.b16.start [1/6] (short) %v2301_v17, %v2297_v16, 128  ;;  %v2562_v26 = vld [vmem:[#allocation3 + $0x14] sm:$0xf]  ;;  %v2304_v29 = vld [vmem:[#allocation3 + $0x10] sm:$0xf]  ;;  %v2306_v30 = vld [vmem:[#allocation3 + $0x18] sm:$0xf0]  ;;  %v2377_v32 = vor.u32 %v2571_v25, %v2376_v23  ;;  %v2381_v33 = vor.u32 %v2570_v22, %v2378_v24 }
  0x17   :  { %v2563_v31 = vld [vmem:[#allocation3 + $0x14] sm:$0xf0]  ;;  %v2309_v35 = vor.u32 %v2562_v26, %v2306_v30  ;;  %v639_v37 = vld [vmem:[#allocation3 + $0x70] sm:$0xff]  ;;  %v84_v40 = vld [vmem:[#allocation3 + $0x20] sm:$0xff]  ;;  %vm203_vm0 = vcmask 1043456   ;;  %vm154_vm1 = vcmask 326656  }
  0x18   :  { %v2305_v34 = vor.u32 %v2563_v31, %v2304_v29  ;;  %v905_v36 = vld [vmem:[#allocation3 + $0x98] sm:$0xff]  ;;  %v653_v41 = vunpack.c.l.b16 %v639_v37  ;;  %v654_v42 = vunpack.c.h.b16 %v639_v37  ;;  %v101_v43 = vunpack.c.l.b16 %v84_v40  ;;  %v78_v51 = vld [vmem:[#allocation6 + $0x10] sm:$0xf]  ;;  %v2559_v55 = vld [vmem:[#allocation6 + $0x8] sm:$0xff]  ;;  %s2716_s16 = smov [#allocation9]   ;;  %s2283_s20 = sshll.u32 %s3496_s5, 4  ;;  %s2284_s20 = int_to_ptr.hbm [resolvable:$true] %s2283_s20 }
  0x19   :  { %v919_v38 = vunpack.c.l.b16 %v905_v36  ;;  %v920_v39 = vunpack.c.h.b16 %v905_v36  ;;  %v102_v44 = vunpack.c.h.b16 %v84_v40  ;;  %v148_v52 = vunpack.c.l.b16 %v78_v51  ;;  %v2564_v56 = vld [vmem:[#allocation3 + $0x2c] sm:$0xf]  ;;  %v2336_v57 = vld [vmem:[#allocation3 + $0x28] sm:$0xf]  ;;  %v2338_v58 = vld [vmem:[#allocation3 + $0x30] sm:$0xf0] }
  0x1a   :  { %v659_v47 = vpack.c.b16 %v653_v41, %v653_v41  ;;  %v660_v48 = vpack.c.b16 %v654_v42, %v654_v42  ;;  %v107_v49 = vpack.c.b16 %v101_v43, %v101_v43  ;;  %v2565_v59 = vld [vmem:[#allocation3 + $0x2c] sm:$0xf0]  ;;  %v2558_v60 = vld [vmem:[#allocation6] sm:$0xff]  ;;  %v2341_v62 = vor.u32 %v2564_v56, %v2338_v58  ;;  %v2566_v63 = vld [vmem:[#allocation3 + $0x3c] sm:$0xf]  ;;  %s2281_s17 = sshll.u32 %s2716_s16, 4  ;;  %s2282_s17 = int_to_ptr.vmem [resolvable:$true] %s2281_s17 }
  0x1b   :  { %v925_v45 = vpack.c.b16 %v919_v38, %v919_v38  ;;  %v926_v46 = vpack.c.b16 %v920_v39, %v920_v39  ;;  %v108_v50 = vpack.c.b16 %v102_v44, %v102_v44  ;;  %v151_v53 = vpack.c.b16 %v148_v52, %v148_v52  ;;  %v2344_v0 = vld [vmem:[#allocation3 + $0x38] sm:$0xf]  ;;  %v2346_v1 = vld [vmem:[#allocation3 + $0x40] sm:$0xf0]  ;;  %v2567_v2 = vld [vmem:[#allocation3 + $0x3c] sm:$0xf0] }
  0x1c   :  { %v2337_v61 = vor.u32 %v2565_v59, %v2336_v57  ;;  %v2345_v3 = vor.u32 %v2567_v2, %v2344_v0  ;;  %v2349_v4 = vor.u32 %v2566_v63, %v2346_v1  ;;  %v373_v5 = vld [vmem:[#allocation3 + $0x48] sm:$0xff]  ;;  %v2588_v41 = vld [vmem:[#allocation3 + $0x11c] sm:$0xf]  ;;  %v2528_v42 = vld [vmem:[#allocation3 + $0x118] sm:$0xf] }
  0x1d   :  { %v205_v54 = vsel %vm203_vm0, %v151_v53, 0  ;;  %v387_v6 = vunpack.c.l.b16 %v373_v5  ;;  %v388_v7 = vunpack.c.h.b16 %v373_v5  ;;  %v2530_v43 = vld [vmem:[#allocation3 + $0x120] sm:$0xf0]  ;;  %v2504_v51 = vld [vmem:[#allocation3 + $0x100] sm:$0xf] }
  0x1e   :  { %212 = vmatpush.bf16.msra.mxu0 %v205_v54  ;;  %744 = vmatpush.bf16.msra.mxu2 %v205_v54  ;;  %v2506_v52 = vld [vmem:[#allocation3 + $0x108] sm:$0xf0]  ;;  %v2587_v53 = vld [vmem:[#allocation3 + $0x104] sm:$0xf0]  ;;  %v2576_v63 = vld [vmem:[#allocation3 + $0xa4] sm:$0xf] }
  0x1f   :  { %1010 = vmatpush.bf16.msra.mxu3 %v205_v54  ;;  %478 = vmatpush.bf16.msra.mxu1 %v205_v54  ;;  %v393_v8 = vpack.c.b16 %v387_v6, %v387_v6  ;;  %v394_v9 = vpack.c.b16 %v388_v7, %v388_v7  ;;  %v2590_v59 = vld [vmem:[#allocation3 + $0x12c] sm:$0xf]  ;;  %v2432_v0 = vld [vmem:[#allocation3 + $0xa0] sm:$0xf]  ;;  %v2577_v2 = vld [vmem:[#allocation3 + $0xa4] sm:$0xf0] }
  0x20   :  { %v2434_v1 = vld [vmem:[#allocation3 + $0xa8] sm:$0xf0] }
  0x22   :  { %213 = vmatpush.bf16.msra.mxu0 %v2559_v55  ;;  %745 = vmatpush.bf16.msra.mxu2 %v2559_v55 }
  0x23   :  { %934 = vxpose.binary.xlu1.c.b16.cont [2/6] (short) %v2413_v28, %v2409_v27, 128 }
  0x24   :  { %668 = vxpose.binary.xlu0.c.b16.cont [2/6] (short) %v2381_v33, %v2377_v32, 128  ;;  %v2584_v32 = vld [vmem:[#allocation3 + $0xf4] sm:$0xf]  ;;  %v2496_v33 = vld [vmem:[#allocation3 + $0xf0] sm:$0xf] }
  0x25   :  { %1011 = vmatpush.bf16.msra.mxu3 %v2559_v55  ;;  %479 = vmatpush.bf16.msra.mxu1 %v2559_v55 }
  0x26   :  { %116 = vxpose.binary.xlu2.c.b16.cont [2/6] (short) %v2309_v35, %v2305_v34, 128  ;;  %v2498_v34 = vld [vmem:[#allocation3 + $0xf8] sm:$0xf0]  ;;  %v2585_v35 = vld [vmem:[#allocation3 + $0xf4] sm:$0xf0] }
  0x27   :  { %214 = vmatpush.bf16.msra.mxu0 %v2558_v60  ;;  %746 = vmatpush.bf16.msra.mxu2 %v2558_v60  ;;  %v2501_v36 = vor.u32 %v2584_v32, %v2498_v34  ;;  %v2497_v37 = vor.u32 %v2585_v35, %v2496_v33  ;;  %v2440_v32 = vld [vmem:[#allocation3 + $0xb0] sm:$0xf]  ;;  %v2442_v33 = vld [vmem:[#allocation3 + $0xb8] sm:$0xf0]  ;;  %v2579_v34 = vld [vmem:[#allocation3 + $0xb4] sm:$0xf0] }
  0x29   :  { %1012 = vmatpush.bf16.msra.mxu3 %v2558_v60  ;;  %480 = vmatpush.bf16.msra.mxu1 %v2558_v60 }
  0x2b   :  { %1808 = vmatpush.bf16.msrb.mxu2 %v205_v54  ;;  %1276 = vmatpush.bf16.msrb.mxu0 %v205_v54 }
  0x2d   :  { %2074 = vmatpush.bf16.msrb.mxu3 %v205_v54  ;;  %1542 = vmatpush.bf16.msrb.mxu1 %v205_v54 }
  0x2f   :  { %1809 = vmatpush.bf16.msrb.mxu2 %v2559_v55  ;;  %1277 = vmatpush.bf16.msrb.mxu0 %v2559_v55 }
  0x31   :  { %2075 = vmatpush.bf16.msrb.mxu3 %v2559_v55  ;;  %1543 = vmatpush.bf16.msrb.mxu1 %v2559_v55  ;;  %v2505_v55 = vor.u32 %v2587_v53, %v2504_v51 }
  0x33   :  { %935 = vxpose.binary.xlu1.c.b16.end [3/6] (short) %v926_v46, %v925_v45, 128  ;;  %v2589_v46 = vld [vmem:[#allocation3 + $0x11c] sm:$0xf0] }
  0x34   :  { %669 = vxpose.binary.xlu0.c.b16.end [3/6] (short) %v660_v48, %v659_v47, 128  ;;  %v2533_v47 = vor.u32 %v2588_v41, %v2530_v43  ;;  %v2529_v48 = vor.u32 %v2589_v46, %v2528_v42  ;;  %v2441_v42 = vor.u32 %v2579_v34, %v2440_v32 }
  0x35   :  { %1810 = vmatpush.bf16.msrb.mxu2 %v2558_v60  ;;  %2076 = vmatpush.bf16.msrb.mxu3 %v2558_v60 }
  0x36   :  { %117 = vxpose.binary.xlu2.c.b16.end [3/6] (short) %v108_v50, %v107_v49, 128  ;;  %v2586_v50 = vld [vmem:[#allocation3 + $0x104] sm:$0xf] }
  0x37   :  { %1278 = vmatpush.bf16.msrb.mxu0 %v2558_v60  ;;  %1544 = vmatpush.bf16.msrb.mxu1 %v2558_v60  ;;  %v2509_v54 = vor.u32 %v2586_v50, %v2506_v52  ;;  %v2536_v60 = vld [vmem:[#allocation3 + $0x128] sm:$0xf] }
  0x93   :  { %1731 = vxpose.binary.xlu1.c.b16.start [1/6] (short) %v2501_v36, %v2497_v37, 128 }
  0x94   :  { %401 = vxpose.binary.xlu0.c.b16.start [1/6] (short) %v2341_v62, %v2337_v61, 128  ;;  %v2538_v61 = vld [vmem:[#allocation3 + $0x130] sm:$0xf0]  ;;  %v2591_v62 = vld [vmem:[#allocation3 + $0x12c] sm:$0xf0] }
  0x95   :  { %v2537_v5 = vor.u32 %v2591_v62, %v2536_v60  ;;  %v2541_v6 = vor.u32 %v2590_v59, %v2538_v61 }
  0x96   :  { %1997 = vxpose.binary.xlu2.c.b16.start [1/6] (short) %v2533_v47, %v2529_v48, 128  ;;  %v1171_v48 = vld [vmem:[#allocation3 + $0xc0] sm:$0xff] }
  0x97   :  { %v1186_v50 = vunpack.c.h.b16 %v1171_v48 }
  0xa3   :  { %1732 = vxpose.binary.xlu1.c.b16.cont [2/6] (short) %v2509_v54, %v2505_v55, 128  ;;  %v1192_v54 = vpack.c.b16 %v1186_v50, %v1186_v50 }
  0xa4   :  { %402 = vxpose.binary.xlu0.c.b16.cont [2/6] (short) %v2349_v4, %v2345_v3, 128 }
  0xa6   :  { %1998 = vxpose.binary.xlu2.c.b16.cont [2/6] (short) %v2541_v6, %v2537_v5, 128 }
  0xb4   :  { %403 = vxpose.binary.xlu0.c.b16.end [3/6] (short) %v394_v9, %v393_v8, 128  ;;  %v2433_v8 = vor.u32 %v2577_v2, %v2432_v0  ;;  %v2437_v9 = vor.u32 %v2576_v63, %v2434_v1 }
  0xb7   :  { %v123_v10 = vpop.trf.xlu2 }
  0xb8   :  { %2318 = vmatmul.msk.bf16.vlgmr.msra.gmra.mxu0 %vm154_vm1, %v123_v10  ;;  %v1703_v10 = vld [vmem:[#allocation3 + $0x110] sm:$0xff] }
  0xbf   :  { %v2757_v11 = vpop.trf.xlu2  ;;  %v941_v12 = vpop.trf.xlu1 }
  0xc0   :  { %2414 = vmatmul.msk.bf16.vlgmr.msra.gmra.mxu3 %vm154_vm1, %v941_v12  ;;  %v675_v13 = vpop.trf.xlu0  ;;  %v1717_v12 = vunpack.c.l.b16 %v1703_v10 }
  0xc1   :  { %2382 = vmatmul.msk.bf16.vlgmr.msra.gmra.mxu2 %vm154_vm1, %v675_v13  ;;  %v1718_v13 = vunpack.c.h.b16 %v1703_v10 }
  0xc7   :  { %v125_v14 = vpop.trf.xlu2  ;;  %v2761_v15 = vpop.trf.xlu1 }
  0xc8   :  { %2319 = vmatmul.msk.bf16.gmra.mxu0 %vm154_vm1, %v125_v14  ;;  %v2764_v16 = vpop.trf.xlu0  ;;  %v1723_v14 = vpack.c.b16 %v1717_v12, %v1717_v12 }
  0xcf   :  { %v2766_v17 = vpop.trf.xlu2  ;;  %v943_v18 = vpop.trf.xlu1 }
  0xd0   :  { %2415 = vmatmul.msk.bf16.gmra.mxu3 %vm154_vm1, %v943_v18  ;;  %v677_v19 = vpop.trf.xlu0  ;;  %v1724_v18 = vpack.c.b16 %v1718_v13, %v1718_v13 }
  0xd1   :  { %2383 = vmatmul.msk.bf16.gmra.mxu2 %vm154_vm1, %v677_v19 }
  0xd2   :  { %1733 = vxpose.binary.xlu1.c.b16.end [3/6] (short) %v1724_v18, %v1723_v14, 128 }
  0xd7   :  { %v127_v20 = vpop.trf.xlu2  ;;  %v2770_v21 = vpop.trf.xlu1 }
  0xd8   :  { %2320 = vmatmul.msk.bf16.gmra.mxu0 %vm154_vm1, %v127_v20  ;;  %v2773_v22 = vpop.trf.xlu0 }
  0xdf   :  { %v2775_v23 = vpop.trf.xlu2  ;;  %v945_v24 = vpop.trf.xlu1 }
  0xe0   :  { %2416 = vmatmul.msk.bf16.gmra.mxu3 %vm154_vm1, %v945_v24  ;;  %v679_v25 = vpop.trf.xlu0 }
  0xe1   :  { %2384 = vmatmul.msk.bf16.gmra.mxu2 %vm154_vm1, %v679_v25  ;;  %v1969_v25 = vld [vmem:[#allocation3 + $0x138] sm:$0xff] }
  0xe7   :  { %v129_v26 = vpop.trf.xlu2  ;;  %v2779_v27 = vpop.trf.xlu1 }
  0xe8   :  { %2321 = vmatmul.msk.bf16.gmra.mxu0 %vm154_vm1, %v129_v26  ;;  %v2782_v28 = vpop.trf.xlu0  ;;  %v2578_v26 = vld [vmem:[#allocation3 + $0xb4] sm:$0xf] }
  0xe9   :  { %v2445_v43 = vor.u32 %v2578_v26, %v2442_v33 }
  0xef   :  { %v2784_v29 = vpop.trf.xlu2  ;;  %v947_v30 = vpop.trf.xlu1 }
  0xf0   :  { %2417 = vmatmul.msk.bf16.gmra.mxu3 %vm154_vm1, %v947_v30  ;;  %v681_v31 = vpop.trf.xlu0  ;;  %v1983_v30 = vunpack.c.l.b16 %v1969_v25 }
  0xf1   :  { %2385 = vmatmul.msk.bf16.gmra.mxu2 %vm154_vm1, %v681_v31  ;;  %v1984_v31 = vunpack.c.h.b16 %v1969_v25 }
  0xf2   :  { %v1989_v37 = vpack.c.b16 %v1983_v30, %v1983_v30 }
  0xf7   :  { %v131_v38 = vpop.trf.xlu2  ;;  %v2788_v39 = vpop.trf.xlu1 }
  0xf8   :  { %2322 = vmatmul.msk.bf16.gmra.mxu0 %vm154_vm1, %v131_v38  ;;  %v2791_v40 = vpop.trf.xlu0  ;;  %v1990_v38 = vpack.c.b16 %v1984_v31, %v1984_v31 }
  0xfa   :  { %1999 = vxpose.binary.xlu2.c.b16.end [3/6] (short) %v1990_v38, %v1989_v37, 128 }
  0xff   :  { %v2793_v44 = vpop.trf.xlu2  ;;  %v949_v45 = vpop.trf.xlu1 }
 0x100   :  { %2418 = vmatmul.msk.bf16.gmra.mxu3 %vm154_vm1, %v949_v45  ;;  %v683_v49 = vpop.trf.xlu0 }
 0x101   :  { %2386 = vmatmul.msk.bf16.gmra.mxu2 %vm154_vm1, %v683_v49  ;;  %v1185_v49 = vunpack.c.l.b16 %v1171_v48 }
 0x103   :  { %v1191_v53 = vpack.c.b16 %v1185_v49, %v1185_v49 }
 0x107   :  { %v133_v56 = vpop.trf.xlu2  ;;  %v2797_v57 = vpop.trf.xlu1 }
 0x108   :  { %2323 = vmatmul.msk.bf16.gmra.mxu0 %vm154_vm1, %v133_v56  ;;  %v2800_v58 = vpop.trf.xlu0  ;;  %v2825_v56 = vld [vmem:[%s3493_s2] ss:$0 sm:$0xff] }
 0x10f   :  { %v2802_v3 = vpop.trf.xlu2  ;;  %v951_v4 = vpop.trf.xlu1 }
 0x110   :  { %2419 = vmatmul.msk.bf16.gmra.mxu3 %vm154_vm1, %v951_v4  ;;  %v685_v7 = vpop.trf.xlu0 }
 0x111   :  { %2387 = vmatmul.msk.bf16.gmra.mxu2 %vm154_vm1, %v685_v7 }
 0x114   :  { %1199 = vxpose.binary.xlu0.c.b16.start [1/6] (short) %v2437_v9, %v2433_v8, 128 }
 0x117   :  { %v135_v19 = vpop.trf.xlu2  ;;  %v2806_v20 = vpop.trf.xlu1 }
 0x118   :  { %2324 = vmatmul.msk.bf16.gmra.mxu0 %vm154_vm1, %v135_v19  ;;  %v2809_v24 = vpop.trf.xlu0 }
 0x11f   :  { %v2811_v35 = vpop.trf.xlu2  ;;  %v953_v36 = vpop.trf.xlu1 }
 0x120   :  { %2420 = vmatmul.msk.bf16.gmra.mxu3 %vm154_vm1, %v953_v36  ;;  %v687_v41 = vpop.trf.xlu0 }
 0x121   :  { %2388 = vmatmul.msk.bf16.gmra.mxu2 %vm154_vm1, %v687_v41 }
 0x124   :  { %1200 = vxpose.binary.xlu0.c.b16.cont [2/6] (short) %v2445_v43, %v2441_v42, 128 }
 0x127   :  { %v137_v45 = vpop.trf.xlu2  ;;  %v2815_v46 = vpop.trf.xlu1 }
 0x128   :  { %2325 = vmatmul.msk.bf16.gmra.mxu0 %vm154_vm1, %v137_v45  ;;  %v2818_v47 = vpop.trf.xlu0 }
 0x12f   :  { %v955_v51 = vpop.trf.xlu1 }
 0x130   :  { %2421 = vmatmul.msk.bf16.gmra.mxu3 %vm154_vm1, %v955_v51  ;;  %v689_v52 = vpop.trf.xlu0 }
 0x131   :  { %2389 = vmatmul.msk.bf16.gmra.mxu2 %vm154_vm1, %v689_v52 }
 0x134   :  { %1201 = vxpose.binary.xlu0.c.b16.end [3/6] (short) %v1192_v54, %v1191_v53, 128 }
 0x135   :  { %v216_v55 = vpop.f32.mrf.mxu0 }
 0x136   :  { %v217_v60 = vadd.f32 %v2825_v56, %v216_v55 }
 0x138   :  { %2326 = vmatmul.msk.bf16.gmra.mxu0 %vm154_vm1, %v2757_v11  ;;  %v2829_v59 = vpop.trf.xlu0  ;;  %v296_v62 = vmax.f32 %v217_v60, 0.0 }
 0x13d   :  { %v218_v61 = vpop.f32.mrf.mxu0 }
 0x13e   :  { %v219_v63 = vadd.f32 %v2825_v56, %v218_v61 }
 0x140   :  { %v297_v0 = vmax.f32 %v219_v63, 0.0  ;;  %2422 = vmatmul.msk.bf16.gmra.mxu3 %vm154_vm1, %v2761_v15  ;;  %v409_v1 = vpop.trf.xlu0 }
 0x141   :  { %2350 = vmatmul.msk.bf16.vlgmr.msra.gmra.mxu1 %vm154_vm1, %v409_v1  ;;  %2390 = vmatmul.msk.bf16.gmra.mxu2 %vm154_vm1, %v2764_v16 }
 0x142   :  { %v329_v2 = vadd.f32 %v297_v0, %v296_v62 }
 0x143   :  { %v1014_v11 = vpop.f32.mrf.mxu3 }
 0x144   :  { %v748_v5 = vpop.f32.mrf.mxu2  ;;  %v1015_v8 = vadd.f32 %v2825_v56, %v1014_v11 }
 0x145   :  { %v221_v4 = vpop.f32.mrf.mxu0  ;;  %v749_v12 = vadd.f32 %v2825_v56, %v748_v5 }
 0x146   :  { %v222_v6 = vadd.f32 %v2825_v56, %v221_v4  ;;  %v1094_v13 = vmax.f32 %v1015_v8, 0.0 }
 0x147   :  { %v828_v30 = vmax.f32 %v749_v12, 0.0 }
 0x148   :  { %v298_v7 = vmax.f32 %v222_v6, 0.0  ;;  %2327 = vmatmul.msk.bf16.gmra.mxu0 %vm154_vm1, %v2766_v17  ;;  %v2842_v9 = vpop.trf.xlu0 }
 0x14a   :  { %v330_v15 = vadd.f32 %v329_v2, %v298_v7 }
 0x14b   :  { %v1016_v10 = vpop.f32.mrf.mxu3 }
 0x14c   :  { %v1017_v16 = vadd.f32 %v2825_v56, %v1016_v10  ;;  %v750_v18 = vpop.f32.mrf.mxu2 }
 0x14d   :  { %v223_v14 = vpop.f32.mrf.mxu0  ;;  %v751_v25 = vadd.f32 %v2825_v56, %v750_v18 }
 0x14e   :  { %v224_v19 = vadd.f32 %v2825_v56, %v223_v14  ;;  %v1095_v26 = vmax.f32 %v1017_v16, 0.0 }
 0x14f   :  { %v829_v32 = vmax.f32 %v751_v25, 0.0 }
 0x150   :  { %v299_v31 = vmax.f32 %v224_v19, 0.0  ;;  %v1127_v17 = vadd.f32 %v1095_v26, %v1094_v13  ;;  %2423 = vmatmul.msk.bf16.gmra.mxu3 %vm154_vm1, %v2770_v21  ;;  %v411_v33 = vpop.trf.xlu0 }
 0x151   :  { %v861_v36 = vadd.f32 %v829_v32, %v828_v30  ;;  %2351 = vmatmul.msk.bf16.gmra.mxu1 %vm154_vm1, %v411_v33  ;;  %2391 = vmatmul.msk.bf16.gmra.mxu2 %vm154_vm1, %v2773_v22 }
 0x152   :  { %v331_v34 = vadd.f32 %v330_v15, %v299_v31 }
 0x153   :  { %v1019_v37 = vpop.f32.mrf.mxu3 }
 0x154   :  { %v1020_v38 = vadd.f32 %v2825_v56, %v1019_v37  ;;  %v753_v42 = vpop.f32.mrf.mxu2 }
 0x155   :  { %v226_v41 = vpop.f32.mrf.mxu0  ;;  %v754_v45 = vadd.f32 %v2825_v56, %v753_v42  ;;  %v2580_v42 = vld [vmem:[#allocation3 + $0xcc] sm:$0xf] }
 0x156   :  { %v227_v43 = vadd.f32 %v2825_v56, %v226_v41  ;;  %v1096_v48 = vmax.f32 %v1020_v38, 0.0 }
 0x157   :  { %v830_v21 = vmax.f32 %v754_v45, 0.0  ;;  %v2466_v45 = vld [vmem:[#allocation3 + $0xd0] sm:$0xf0] }
 0x158   :  { %v300_v49 = vmax.f32 %v227_v43, 0.0  ;;  %v1128_v50 = vadd.f32 %v1127_v17, %v1096_v48  ;;  %2328 = vmatmul.msk.bf16.gmra.mxu0 %vm154_vm1, %v2775_v23  ;;  %v2858_v51 = vpop.trf.xlu0  ;;  %v2464_v43 = vld [vmem:[#allocation3 + $0xc8] sm:$0xf] }
 0x159   :  { %v862_v22 = vadd.f32 %v861_v36, %v830_v21  ;;  %v2469_v21 = vor.u32 %v2580_v42, %v2466_v45 }
 0x15a   :  { %v332_v52 = vadd.f32 %v331_v34, %v300_v49  ;;  %v2581_v49 = vld [vmem:[#allocation3 + $0xcc] sm:$0xf0] }
 0x15b   :  { %v1021_v53 = vpop.f32.mrf.mxu3 }
 0x15c   :  { %v1022_v54 = vadd.f32 %v2825_v56, %v1021_v53  ;;  %v755_v60 = vpop.f32.mrf.mxu2 }
 0x15d   :  { %v228_v55 = vpop.f32.mrf.mxu0  ;;  %v756_v62 = vadd.f32 %v2825_v56, %v755_v60 }
 0x15e   :  { %v229_v61 = vadd.f32 %v2825_v56, %v228_v55  ;;  %v1097_v63 = vmax.f32 %v1022_v54, 0.0 }
 0x15f   :  { %v831_v1 = vmax.f32 %v756_v62, 0.0 }
 0x160   :  { %v301_v0 = vmax.f32 %v229_v61, 0.0  ;;  %v1129_v2 = vadd.f32 %v1128_v50, %v1097_v63  ;;  %2424 = vmatmul.msk.bf16.gmra.mxu3 %vm154_vm1, %v2779_v27  ;;  %v413_v23 = vpop.trf.xlu0 }
 0x161   :  { %v863_v4 = vadd.f32 %v862_v22, %v831_v1  ;;  %2352 = vmatmul.msk.bf16.gmra.mxu1 %vm154_vm1, %v413_v23  ;;  %2392 = vmatmul.msk.bf16.gmra.mxu2 %vm154_vm1, %v2782_v28  ;;  %v2465_v22 = vor.u32 %v2581_v49, %v2464_v43 }
 0x162   :  { %v333_v11 = vadd.f32 %v332_v52, %v301_v0 }
 0x163   :  { %v1024_v5 = vpop.f32.mrf.mxu3  ;;  %1465 = vxpose.binary.xlu1.c.b16.start [1/6] (short) %v2469_v21, %v2465_v22, 128 }
 0x164   :  { %v1025_v6 = vadd.f32 %v2825_v56, %v1024_v5  ;;  %v758_v8 = vpop.f32.mrf.mxu2 }
 0x165   :  { %v231_v7 = vpop.f32.mrf.mxu0  ;;  %v759_v10 = vadd.f32 %v2825_v56, %v758_v8 }
 0x166   :  { %v232_v15 = vadd.f32 %v2825_v56, %v231_v7  ;;  %v1098_v12 = vmax.f32 %v1025_v6, 0.0 }
 0x167   :  { %v832_v27 = vmax.f32 %v759_v10, 0.0 }
 0x168   :  { %v302_v13 = vmax.f32 %v232_v15, 0.0  ;;  %v1130_v16 = vadd.f32 %v1129_v2, %v1098_v12  ;;  %2329 = vmatmul.msk.bf16.gmra.mxu0 %vm154_vm1, %v2784_v29  ;;  %v2873_v14 = vpop.trf.xlu0  ;;  %v2582_v12 = vld [vmem:[#allocation3 + $0xdc] sm:$0xf] }
 0x169   :  { %v864_v28 = vadd.f32 %v863_v4, %v832_v27  ;;  %v2474_v27 = vld [vmem:[#allocation3 + $0xe0] sm:$0xf0] }
 0x16a   :  { %v334_v18 = vadd.f32 %v333_v11, %v302_v13  ;;  %v2472_v13 = vld [vmem:[#allocation3 + $0xd8] sm:$0xf] }
 0x16b   :  { %v1026_v19 = vpop.f32.mrf.mxu3 }
 0x16c   :  { %v1027_v25 = vadd.f32 %v2825_v56, %v1026_v19  ;;  %v760_v30 = vpop.f32.mrf.mxu2 }
 0x16d   :  { %v233_v26 = vpop.f32.mrf.mxu0  ;;  %v761_v32 = vadd.f32 %v2825_v56, %v760_v30 }
 0x16e   :  { %v234_v31 = vadd.f32 %v2825_v56, %v233_v26  ;;  %v1099_v17 = vmax.f32 %v1027_v25, 0.0 }
 0x16f   :  { %v833_v34 = vmax.f32 %v761_v32, 0.0 }
 0x170   :  { %v303_v33 = vmax.f32 %v234_v31, 0.0  ;;  %v1131_v36 = vadd.f32 %v1130_v16, %v1099_v17  ;;  %2425 = vmatmul.msk.bf16.gmra.mxu3 %vm154_vm1, %v2788_v39  ;;  %v415_v29 = vpop.trf.xlu0 }
 0x171   :  { %v865_v38 = vadd.f32 %v864_v28, %v833_v34  ;;  %2353 = vmatmul.msk.bf16.gmra.mxu1 %vm154_vm1, %v415_v29  ;;  %2393 = vmatmul.msk.bf16.gmra.mxu2 %vm154_vm1, %v2791_v40  ;;  %v2477_v28 = vor.u32 %v2582_v12, %v2474_v27 }
 0x172   :  { %v335_v37 = vadd.f32 %v334_v18, %v303_v33  ;;  %v2583_v18 = vld [vmem:[#allocation3 + $0xdc] sm:$0xf0] }
 0x173   :  { %v1029_v41 = vpop.f32.mrf.mxu3  ;;  %v2473_v26 = vor.u32 %v2583_v18, %v2472_v13 }
 0x174   :  { %v1030_v48 = vadd.f32 %v2825_v56, %v1029_v41  ;;  %v763_v52 = vpop.f32.mrf.mxu2 }
 0x175   :  { %v236_v50 = vpop.f32.mrf.mxu0  ;;  %v764_v53 = vadd.f32 %v2825_v56, %v763_v52  ;;  %1466 = vxpose.binary.xlu1.c.b16.cont [2/6] (short) %v2477_v28, %v2473_v26, 128 }
 0x176   :  { %v237_v39 = vadd.f32 %v2825_v56, %v236_v50  ;;  %v1100_v54 = vmax.f32 %v1030_v48, 0.0  ;;  %v1437_v50 = vld [vmem:[#allocation3 + $0xe8] sm:$0xff] }
 0x177   :  { %v834_v60 = vmax.f32 %v764_v53, 0.0  ;;  %v1452_v53 = vunpack.c.h.b16 %v1437_v50 }
 0x178   :  { %v304_v55 = vmax.f32 %v237_v39, 0.0  ;;  %v1132_v40 = vadd.f32 %v1131_v36, %v1100_v54  ;;  %2330 = vmatmul.msk.bf16.gmra.mxu0 %vm154_vm1, %v2793_v44  ;;  %v2888_v61 = vpop.trf.xlu0  ;;  %v1451_v39 = vunpack.c.l.b16 %v1437_v50 }
 0x179   :  { %v866_v63 = vadd.f32 %v865_v38, %v834_v60 }
 0x17a   :  { %v336_v62 = vadd.f32 %v335_v37, %v304_v55  ;;  %v1457_v60 = vpack.c.b16 %v1451_v39, %v1451_v39 }
 0x17b   :  { %v1031_v0 = vpop.f32.mrf.mxu3 }
 0x17c   :  { %v1032_v1 = vadd.f32 %v2825_v56, %v1031_v0  ;;  %v765_v23 = vpop.f32.mrf.mxu2 }
 0x17d   :  { %v238_v2 = vpop.f32.mrf.mxu0  ;;  %v766_v4 = vadd.f32 %v2825_v56, %v765_v23 }
 0x17e   :  { %v239_v11 = vadd.f32 %v2825_v56, %v238_v2  ;;  %v1101_v5 = vmax.f32 %v1032_v1, 0.0 }
 0x17f   :  { %v835_v6 = vmax.f32 %v766_v4, 0.0 }
 0x180   :  { %v1133_v7 = vadd.f32 %v1132_v40, %v1101_v5  ;;  %2426 = vmatmul.msk.bf16.gmra.mxu3 %vm154_vm1, %v2797_v57  ;;  %v417_v44 = vpop.trf.xlu0  ;;  %v305_v8 = vmax.f32 %v239_v11, 0.0  ;;  %v1458_v40 = vpack.c.b16 %v1452_v53, %v1452_v53 }
 0x181   :  { %v867_v15 = vadd.f32 %v866_v63, %v835_v6  ;;  %2354 = vmatmul.msk.bf16.gmra.mxu1 %vm154_vm1, %v417_v44  ;;  %2394 = vmatmul.msk.bf16.gmra.mxu2 %vm154_vm1, %v2800_v58 }
 0x182   :  { %v337_v57 = vadd.f32 %v336_v62, %v305_v8 }
 0x183   :  { %v1034_v10 = vpop.f32.mrf.mxu3 }
 0x184   :  { %v1035_v16 = vadd.f32 %v2825_v56, %v1034_v10  ;;  %v768_v25 = vpop.f32.mrf.mxu2 }
 0x185   :  { %v241_v19 = vpop.f32.mrf.mxu0  ;;  %v769_v31 = vadd.f32 %v2825_v56, %v768_v25  ;;  %1467 = vxpose.binary.xlu1.c.b16.end [3/6] (short) %v1458_v40, %v1457_v60, 128 }
 0x186   :  { %v242_v30 = vadd.f32 %v2825_v56, %v241_v19  ;;  %v1102_v32 = vmax.f32 %v1035_v16, 0.0 }
 0x187   :  { %v836_v58 = vmax.f32 %v769_v31, 0.0 }
 0x188   :  { %v306_v17 = vmax.f32 %v242_v30, 0.0  ;;  %v1134_v33 = vadd.f32 %v1133_v7, %v1102_v32  ;;  %2331 = vmatmul.msk.bf16.gmra.mxu0 %vm154_vm1, %v2802_v3  ;;  %v2903_v34 = vpop.trf.xlu0  ;;  %v956_v7 = vpop.trf.xlu1 }
 0x189   :  { %v868_v29 = vadd.f32 %v867_v15, %v836_v58  ;;  %v138_v15 = vpop.trf.xlu2 }
 0x18a   :  { %v338_v36 = vadd.f32 %v337_v57, %v306_v17 }
 0x18b   :  { %v1036_v37 = vpop.f32.mrf.mxu3 }
 0x18c   :  { %v1037_v38 = vadd.f32 %v2825_v56, %v1036_v37  ;;  %v770_v42 = vpop.f32.mrf.mxu2 }
 0x18d   :  { %v243_v41 = vpop.f32.mrf.mxu0  ;;  %v771_v45 = vadd.f32 %v2825_v56, %v770_v42 }
 0x18e   :  { %v244_v43 = vadd.f32 %v2825_v56, %v243_v41  ;;  %v1103_v48 = vmax.f32 %v1037_v38, 0.0 }
 0x18f   :  { %v837_v49 = vmax.f32 %v771_v45, 0.0 }
 0x190   :  { %v1135_v21 = vadd.f32 %v1134_v33, %v1103_v48  ;;  %2427 = vmatmul.msk.bf16.gmra.mxu3 %vm154_vm1, %v2806_v20  ;;  %v419_v3 = vpop.trf.xlu0  ;;  %v307_v52 = vmax.f32 %v244_v43, 0.0  ;;  %v2928_v26 = vpop.trf.xlu1 }
 0x191   :  { %v869_v22 = vadd.f32 %v868_v29, %v837_v49  ;;  %2355 = vmatmul.msk.bf16.gmra.mxu1 %vm154_vm1, %v419_v3  ;;  %2395 = vmatmul.msk.bf16.gmra.mxu2 %vm154_vm1, %v2809_v24  ;;  %v2005_v31 = vpop.trf.xlu2 }
 0x192   :  { %v339_v0 = vadd.f32 %v338_v36, %v307_v52 }
 0x193   :  { %v1039_v54 = vpop.f32.mrf.mxu3 }
 0x194   :  { %v1040_v55 = vadd.f32 %v2825_v56, %v1039_v54  ;;  %v773_v63 = vpop.f32.mrf.mxu2 }
 0x195   :  { %v246_v62 = vpop.f32.mrf.mxu0  ;;  %v774_v1 = vadd.f32 %v2825_v56, %v773_v63 }
 0x196   :  { %v247_v20 = vadd.f32 %v2825_v56, %v246_v62  ;;  %v1104_v2 = vmax.f32 %v1040_v55, 0.0 }
 0x197   :  { %v838_v11 = vmax.f32 %v774_v1, 0.0 }
 0x198   :  { %v308_v23 = vmax.f32 %v247_v20, 0.0  ;;  %v1136_v4 = vadd.f32 %v1135_v21, %v1104_v2  ;;  %2332 = vmatmul.msk.bf16.gmra.mxu0 %vm154_vm1, %v2811_v35  ;;  %v2918_v24 = vpop.trf.xlu0  ;;  %v2936_v43 = vpop.trf.xlu1 }
 0x199   :  { %v870_v6 = vadd.f32 %v869_v22, %v838_v11  ;;  %v2939_v49 = vpop.trf.xlu2 }
 0x19a   :  { %v340_v5 = vadd.f32 %v339_v0, %v308_v23 }
 0x19b   :  { %v1041_v44 = vpop.f32.mrf.mxu3 }
 0x19c   :  { %v1042_v8 = vadd.f32 %v2825_v56, %v1041_v44  ;;  %v775_v12 = vpop.f32.mrf.mxu2 }
 0x19d   :  { %v248_v10 = vpop.f32.mrf.mxu0  ;;  %v776_v27 = vadd.f32 %v2825_v56, %v775_v12 }
 0x19e   :  { %v249_v13 = vadd.f32 %v2825_v56, %v248_v10  ;;  %v1105_v16 = vmax.f32 %v1042_v8, 0.0 }
 0x19f   :  { %v839_v18 = vmax.f32 %v776_v27, 0.0 }
 0x1a0   :  { %v1137_v28 = vadd.f32 %v1136_v4, %v1105_v16  ;;  %2428 = vmatmul.msk.bf16.gmra.mxu3 %vm154_vm1, %v2815_v46  ;;  %v421_v35 = vpop.trf.xlu0  ;;  %v309_v19 = vmax.f32 %v249_v13, 0.0  ;;  %v2947_v40 = vpop.trf.xlu1 }
 0x1a1   :  { %v871_v25 = vadd.f32 %v870_v6, %v839_v18  ;;  %2356 = vmatmul.msk.bf16.gmra.mxu1 %vm154_vm1, %v421_v35  ;;  %2396 = vmatmul.msk.bf16.gmra.mxu2 %vm154_vm1, %v2818_v47  ;;  %v2950_v0 = vpop.trf.xlu2 }
 0x1a2   :  { %v341_v58 = vadd.f32 %v340_v5, %v309_v19 }
 0x1a3   :  { %v1044_v57 = vpop.f32.mrf.mxu3 }
 0x1a4   :  { %v1045_v30 = vadd.f32 %v2825_v56, %v1044_v57  ;;  %v778_v17 = vpop.f32.mrf.mxu2 }
 0x1a5   :  { %v251_v32 = vpop.f32.mrf.mxu0  ;;  %v779_v46 = vadd.f32 %v2825_v56, %v778_v17 }
 0x1a6   :  { %v252_v33 = vadd.f32 %v2825_v56, %v251_v32  ;;  %v1106_v36 = vmax.f32 %v1045_v30, 0.0 }
 0x1a7   :  { %v840_v37 = vmax.f32 %v779_v46, 0.0 }
 0x1a8   :  { %v310_v29 = vmax.f32 %v252_v33, 0.0  ;;  %v1138_v38 = vadd.f32 %v1137_v28, %v1106_v36  ;;  %2333 = vmatmul.msk.bf16.gmra.mxu0 %vm154_vm1, %v138_v15  ;;  %v2934_v47 = vpop.trf.xlu0  ;;  %v2956_v15 = vpop.trf.xlu1 }
 0x1a9   :  { %v872_v42 = vadd.f32 %v871_v25, %v840_v37  ;;  %v2961_v35 = vpop.trf.xlu2 }
 0x1aa   :  { %v342_v41 = vadd.f32 %v341_v58, %v310_v29 }
 0x1ab   :  { %v1046_v45 = vpop.f32.mrf.mxu3 }
 0x1ac   :  { %v1047_v48 = vadd.f32 %v2825_v56, %v1046_v45  ;;  %v780_v3 = vpop.f32.mrf.mxu2 }
 0x1ad   :  { %v253_v21 = vpop.f32.mrf.mxu0  ;;  %v781_v52 = vadd.f32 %v2825_v56, %v780_v3 }
 0x1ae   :  { %v254_v50 = vadd.f32 %v2825_v56, %v253_v21  ;;  %v1107_v22 = vmax.f32 %v1047_v48, 0.0 }
 0x1af   :  { %v841_v39 = vmax.f32 %v781_v52, 0.0 }
 0x1b0   :  { %v1139_v53 = vadd.f32 %v1138_v38, %v1107_v22  ;;  %2429 = vmatmul.msk.bf16.gmra.mxu3 %vm154_vm1, %v956_v7  ;;  %v423_v54 = vpop.trf.xlu0  ;;  %v311_v55 = vmax.f32 %v254_v50, 0.0  ;;  %v2967_v58 = vpop.trf.xlu1 }
 0x1b1   :  { %v873_v60 = vadd.f32 %v872_v42, %v841_v39  ;;  %2357 = vmatmul.msk.bf16.gmra.mxu1 %vm154_vm1, %v423_v54  ;;  %2397 = vmatmul.msk.bf16.gmra.mxu2 %vm154_vm1, %v2829_v59 }
 0x1b2   :  { %v343_v2 = vadd.f32 %v342_v41, %v311_v55 }
 0x1b3   :  { %v1049_v62 = vpop.f32.mrf.mxu3 }
 0x1b4   :  { %v1050_v63 = vadd.f32 %v2825_v56, %v1049_v62  ;;  %v783_v1 = vpop.f32.mrf.mxu2 }
 0x1b5   :  { %v256_v20 = vpop.f32.mrf.mxu0  ;;  %v784_v11 = vadd.f32 %v2825_v56, %v783_v1 }
 0x1b6   :  { %v257_v23 = vadd.f32 %v2825_v56, %v256_v20  ;;  %v1108_v4 = vmax.f32 %v1050_v63, 0.0 }
 0x1b7   :  { %v842_v6 = vmax.f32 %v784_v11, 0.0 }
 0x1b8   :  { %v312_v5 = vmax.f32 %v257_v23, 0.0  ;;  %v1140_v7 = vadd.f32 %v1139_v53, %v1108_v4  ;;  %v2954_v44 = vpop.trf.xlu0  ;;  %v2978_v54 = vpop.trf.xlu1 }
 0x1b9   :  { %v874_v8 = vadd.f32 %v873_v60, %v842_v6 }
 0x1ba   :  { %v344_v59 = vadd.f32 %v343_v2, %v312_v5 }
 0x1bb   :  { %v1051_v10 = vpop.f32.mrf.mxu3 }
 0x1bc   :  { %v1052_v12 = vadd.f32 %v2825_v56, %v1051_v10  ;;  %v785_v27 = vpop.f32.mrf.mxu2 }
 0x1bd   :  { %v258_v13 = vpop.f32.mrf.mxu0  ;;  %v786_v18 = vadd.f32 %v2825_v56, %v785_v27 }
 0x1be   :  { %v259_v16 = vadd.f32 %v2825_v56, %v258_v13  ;;  %v1109_v28 = vmax.f32 %v1052_v12, 0.0  ;;  %v482_v19 = vpop.f32.mrf.mxu1 }
 0x1bf   :  { %v843_v25 = vmax.f32 %v786_v18, 0.0  ;;  %v483_v36 = vadd.f32 %v2825_v56, %v482_v19 }
 0x1c0   :  { %v1141_v57 = vadd.f32 %v1140_v7, %v1109_v28  ;;  %2542 = vmatmul.msk.bf16.vlgmr.msrb.gmra.mxu3 %vm154_vm1, %v2005_v31  ;;  %v1207_v30 = vpop.trf.xlu0  ;;  %v313_v32 = vmax.f32 %v259_v16, 0.0  ;;  %v2991_v12 = vpop.trf.xlu1 }
 0x1c1   :  { %v875_v17 = vadd.f32 %v874_v8, %v843_v25  ;;  %2358 = vmatmul.msk.bf16.gmra.mxu1 %vm154_vm1, %v2842_v9  ;;  %2446 = vmatmul.msk.bf16.vlgmr.msrb.gmra.mxu0 %vm154_vm1, %v1207_v30  ;;  %v562_v52 = vmax.f32 %v483_v36, 0.0 }
 0x1c2   :  { %2510 = vmatmul.msk.bf16.vlgmr.msrb.gmra.mxu2 %vm154_vm1, %v2928_v26  ;;  %v345_v37 = vadd.f32 %v344_v59, %v313_v32  ;;  %v2009_v26 = vpop.trf.xlu2 }
 0x1c3   :  { %v1054_v33 = vpop.f32.mrf.mxu3 }
 0x1c4   :  { %v1055_v46 = vadd.f32 %v2825_v56, %v1054_v33  ;;  %v788_v31 = vpop.f32.mrf.mxu2 }
 0x1c5   :  { %v261_v29 = vpop.f32.mrf.mxu0  ;;  %v789_v41 = vadd.f32 %v2825_v56, %v788_v31 }
 0x1c6   :  { %v262_v38 = vadd.f32 %v2825_v56, %v261_v29  ;;  %v1110_v9 = vmax.f32 %v1055_v46, 0.0  ;;  %v484_v42 = vpop.f32.mrf.mxu1 }
 0x1c7   :  { %v844_v48 = vmax.f32 %v789_v41, 0.0  ;;  %v485_v3 = vadd.f32 %v2825_v56, %v484_v42 }
 0x1c8   :  { %v314_v45 = vmax.f32 %v262_v38, 0.0  ;;  %v1142_v21 = vadd.f32 %v1141_v57, %v1110_v9  ;;  %v2976_v50 = vpop.trf.xlu0 }
 0x1c9   :  { %v876_v39 = vadd.f32 %v875_v17, %v844_v48  ;;  %v563_v53 = vmax.f32 %v485_v3, 0.0 }
 0x1ca   :  { %v346_v22 = vadd.f32 %v345_v37, %v314_v45  ;;  %v2989_v10 = vpop.trf.xlu2  ;;  %v3003_v37 = vpop.trf.xlu1 }
 0x1cb   :  { %v1056_v55 = vpop.f32.mrf.mxu3  ;;  %v595_v60 = vadd.f32 %v563_v53, %v562_v52 }
 0x1cc   :  { %v1057_v62 = vadd.f32 %v2825_v56, %v1056_v55  ;;  %v790_v20 = vpop.f32.mrf.mxu2 }
 0x1cd   :  { %v263_v63 = vpop.f32.mrf.mxu0  ;;  %v791_v1 = vadd.f32 %v2825_v56, %v790_v20 }
 0x1ce   :  { %v1111_v2 = vmax.f32 %v1057_v62, 0.0  ;;  %v264_v23 = vadd.f32 %v2825_v56, %v263_v63  ;;  %v487_v11 = vpop.f32.mrf.mxu1 }
 0x1cf   :  { %v845_v4 = vmax.f32 %v791_v1, 0.0  ;;  %v488_v6 = vadd.f32 %v2825_v56, %v487_v11 }
 0x1d0   :  { %v1143_v5 = vadd.f32 %v1142_v21, %v1111_v2  ;;  %2543 = vmatmul.msk.bf16.gmra.mxu3 %vm154_vm1, %v2950_v0  ;;  %v1209_v7 = vpop.trf.xlu0  ;;  %v315_v13 = vmax.f32 %v264_v23, 0.0 }
 0x1d1   :  { %v877_v59 = vadd.f32 %v876_v39, %v845_v4  ;;  %v564_v8 = vmax.f32 %v488_v6, 0.0  ;;  %2359 = vmatmul.msk.bf16.gmra.mxu1 %vm154_vm1, %v2858_v51  ;;  %2447 = vmatmul.msk.bf16.gmra.mxu0 %vm154_vm1, %v1209_v7 }
 0x1d2   :  { %2511 = vmatmul.msk.bf16.gmra.mxu2 %vm154_vm1, %v2947_v40  ;;  %v347_v57 = vadd.f32 %v346_v22, %v315_v13  ;;  %v2011_v42 = vpop.trf.xlu2  ;;  %v1747_v63 = vpop.trf.xlu1 }
 0x1d3   :  { %v1059_v27 = vpop.f32.mrf.mxu3  ;;  %v596_v16 = vadd.f32 %v595_v60, %v564_v8 }
 0x1d4   :  { %v1060_v0 = vadd.f32 %v2825_v56, %v1059_v27  ;;  %v793_v28 = vpop.f32.mrf.mxu2 }
 0x1d5   :  { %v266_v18 = vpop.f32.mrf.mxu0  ;;  %v794_v51 = vadd.f32 %v2825_v56, %v793_v28 }
 0x1d6   :  { %v267_v19 = vadd.f32 %v2825_v56, %v266_v18  ;;  %v1112_v25 = vmax.f32 %v1060_v0, 0.0  ;;  %v489_v30 = vpop.f32.mrf.mxu1 }
 0x1d7   :  { %v846_v17 = vmax.f32 %v794_v51, 0.0  ;;  %v490_v46 = vadd.f32 %v2825_v56, %v489_v30 }
 0x1d8   :  { %v316_v32 = vmax.f32 %v267_v19, 0.0  ;;  %v1144_v33 = vadd.f32 %v1143_v5, %v1112_v25  ;;  %v2999_v36 = vpop.trf.xlu0 }
 0x1d9   :  { %v878_v29 = vadd.f32 %v877_v59, %v846_v17  ;;  %v565_v31 = vmax.f32 %v490_v46, 0.0 }
 0x1da   :  { %v3001_v40 = vadd.f32 %v347_v57, %v316_v32  ;;  %v3020_v5 = vpop.trf.xlu2  ;;  %v3029_v27 = vpop.trf.xlu1 }
 0x1db   :  { %v1061_v38 = vpop.f32.mrf.mxu3  ;;  %v597_v41 = vadd.f32 %v596_v16, %v565_v31 }
 0x1dc   :  { %v1062_v9 = vadd.f32 %v2825_v56, %v1061_v38  ;;  %v795_v48 = vpop.f32.mrf.mxu2 }
 0x1dd   :  { %v3006_v45 = vpop.f32.mrf.mxu0  ;;  %v796_v21 = vadd.f32 %v2825_v56, %v795_v48 }
 0x1de   :  { %v1113_v3 = vmax.f32 %v1062_v9, 0.0  ;;  %v492_v52 = vpop.f32.mrf.mxu1 }
 0x1df   :  { %v847_v22 = vmax.f32 %v796_v21, 0.0  ;;  %v493_v53 = vadd.f32 %v2825_v56, %v492_v52 }
 0x1e0   :  { %v1145_v39 = vadd.f32 %v1144_v33, %v1113_v3  ;;  %2544 = vmatmul.msk.bf16.gmra.mxu3 %vm154_vm1, %v2009_v26  ;;  %v1211_v55 = vpop.trf.xlu0 }
 0x1e1   :  { %v879_v60 = vadd.f32 %v878_v29, %v847_v22  ;;  %v566_v62 = vmax.f32 %v493_v53, 0.0  ;;  %2360 = vmatmul.msk.bf16.gmra.mxu1 %vm154_vm1, %v2873_v14  ;;  %2448 = vmatmul.msk.bf16.gmra.mxu0 %vm154_vm1, %v1211_v55 }
 0x1e2   :  { %2512 = vmatmul.msk.bf16.gmra.mxu2 %vm154_vm1, %v2967_v58  ;;  %v2013_v25 = vpop.trf.xlu2  ;;  %v1749_v32 = vpop.trf.xlu1 }
 0x1e3   :  { %v1064_v20 = vpop.f32.mrf.mxu3  ;;  %v598_v1 = vadd.f32 %v597_v41, %v566_v62 }
 0x1e4   :  { %v1065_v2 = vadd.f32 %v2825_v56, %v1064_v20  ;;  %v798_v11 = vpop.f32.mrf.mxu2 }
 0x1e5   :  { %v3017_v23 = vpop.f32.mrf.mxu0  ;;  %v799_v26 = vadd.f32 %v2825_v56, %v798_v11 }
 0x1e6   :  { %v1114_v4 = vmax.f32 %v1065_v2, 0.0  ;;  %v494_v6 = vpop.f32.mrf.mxu1 }
 0x1e7   :  { %v848_v14 = vmax.f32 %v799_v26, 0.0  ;;  %v495_v59 = vadd.f32 %v2825_v56, %v494_v6 }
 0x1e8   :  { %v3022_v7 = vadd.f32 %v1145_v39, %v1114_v4  ;;  %v3025_v8 = vpop.trf.xlu0 }
 0x1e9   :  { %v3027_v58 = vadd.f32 %v879_v60, %v848_v14  ;;  %v567_v13 = vmax.f32 %v495_v59, 0.0 }
 0x1eb   :  { %v3031_v16 = vpop.f32.mrf.mxu3  ;;  %v599_v0 = vadd.f32 %v598_v1, %v567_v13 }
 0x1ec   :  { %v3035_v28 = vpop.f32.mrf.mxu2 }
 0x1ed   :  { %v3033_v18 = vpop.f32.mrf.mxu0 }
 0x1ee   :  { %v497_v19 = vpop.f32.mrf.mxu1 }
 0x1ef   :  { %v498_v51 = vadd.f32 %v2825_v56, %v497_v19 }
 0x1f0   :  { %2545 = vmatmul.msk.bf16.gmra.mxu3 %vm154_vm1, %v2011_v42  ;;  %v1213_v57 = vpop.trf.xlu0  ;;  %v3055_v42 = vpop.trf.xlu1 }
 0x1f1   :  { %v568_v30 = vmax.f32 %v498_v51, 0.0  ;;  %2361 = vmatmul.msk.bf16.gmra.mxu1 %vm154_vm1, %v2888_v61  ;;  %2449 = vmatmul.msk.bf16.gmra.mxu0 %vm154_vm1, %v1213_v57  ;;  %v3053_v61 = vpop.trf.xlu2 }
 0x1f2   :  { %2513 = vmatmul.msk.bf16.gmra.mxu2 %vm154_vm1, %v2991_v12 }
 0x1f3   :  { %v3044_v17 = vpop.f32.mrf.mxu3  ;;  %v600_v33 = vadd.f32 %v599_v0, %v568_v30  ;;  %v2715_v0 = vmov 0.0  }
 0x1f4   :  { %v3048_v29 = vpop.f32.mrf.mxu2  ;;  %73 = vst [vmem:[#allocation2] sm:$0xff] %v2715_v0 }
 0x1f5   :  { %v3046_v46 = vpop.f32.mrf.mxu0 }
 0x1f6   :  { %v499_v31 = vpop.f32.mrf.mxu1 }
 0x1f7   :  { %v500_v38 = vadd.f32 %v2825_v56, %v499_v31 }
 0x1f8   :  { %v3051_v41 = vpop.trf.xlu0  ;;  %v3066_v55 = vpop.trf.xlu1 }
 0x1f9   :  { %v569_v9 = vmax.f32 %v500_v38, 0.0  ;;  %v2015_v20 = vpop.trf.xlu2 }
 0x1fb   :  { %v3057_v48 = vpop.f32.mrf.mxu3  ;;  %v601_v12 = vadd.f32 %v600_v33, %v569_v9 }
 0x1fc   :  { %v3059_v3 = vpop.f32.mrf.mxu2 }
 0x1fd   :  { %v278_v21 = vpop.f32.mrf.mxu0 }
 0x1fe   :  { %v502_v52 = vpop.f32.mrf.mxu1 }
 0x1ff   :  { %v503_v22 = vadd.f32 %v2825_v56, %v502_v52  ;;  %v269_v52 = vadd.f32 %v2825_v56, %v3006_v45  ;;  %v277_v45 = vadd.f32 %v2825_v56, %v3046_v46 }
 0x200   :  { %2546 = vmatmul.msk.bf16.gmra.mxu3 %vm154_vm1, %v2013_v25  ;;  %v1215_v39 = vpop.trf.xlu0 }
 0x201   :  { %v570_v53 = vmax.f32 %v503_v22, 0.0  ;;  %2362 = vmatmul.msk.bf16.gmra.mxu1 %vm154_vm1, %v2903_v34  ;;  %2450 = vmatmul.msk.bf16.gmra.mxu0 %vm154_vm1, %v1215_v39  ;;  %v3076_v34 = vpop.trf.xlu1  ;;  %v3082_v19 = vpop.trf.xlu2  ;;  %v272_v39 = vadd.f32 %v2825_v56, %v3017_v23 }
 0x202   :  { %2514 = vmatmul.msk.bf16.gmra.mxu2 %vm154_vm1, %v1747_v63  ;;  %3497 = vst [vmem:[#allocation13_spill] sm:$0xff] %v3076_v34 }
 0x203   :  { %v3069_v60 = vpop.f32.mrf.mxu3  ;;  %v602_v62 = vadd.f32 %v601_v12, %v570_v53 }
 0x204   :  { %v3071_v2 = vpop.f32.mrf.mxu2 }
 0x205   :  { %v281_v1 = vpop.f32.mrf.mxu0 }
 0x206   :  { %v504_v11 = vpop.f32.mrf.mxu1 }
 0x207   :  { %v505_v26 = vadd.f32 %v2825_v56, %v504_v11 }
 0x208   :  { %v3074_v4 = vpop.trf.xlu0 }
 0x209   :  { %v571_v6 = vmax.f32 %v505_v26, 0.0  ;;  %v3089_v33 = vpop.trf.xlu1  ;;  %v2017_v53 = vpop.trf.xlu2 }
 0x20b   :  { %v3078_v14 = vpop.f32.mrf.mxu3  ;;  %v603_v59 = vadd.f32 %v602_v62, %v571_v6 }
 0x20c   :  { %v3080_v63 = vpop.f32.mrf.mxu2 }
 0x20d   :  { %v283_v13 = vpop.f32.mrf.mxu0 }
 0x20e   :  { %v507_v51 = vpop.f32.mrf.mxu1 }
 0x20f   :  { %v508_v25 = vadd.f32 %v2825_v56, %v507_v51 }
 0x210   :  { %2547 = vmatmul.msk.bf16.gmra.mxu3 %vm154_vm1, %v2015_v20  ;;  %v1217_v57 = vpop.trf.xlu0  ;;  %v317_v20 = vmax.f32 %v269_v52, 0.0 }
 0x211   :  { %v572_v30 = vmax.f32 %v508_v25, 0.0  ;;  %2363 = vmatmul.msk.bf16.gmra.mxu1 %vm154_vm1, %v2918_v24  ;;  %2451 = vmatmul.msk.bf16.gmra.mxu0 %vm154_vm1, %v1217_v57  ;;  %v3105_v26 = vpop.trf.xlu1 }
 0x212   :  { %2515 = vmatmul.msk.bf16.gmra.mxu2 %vm154_vm1, %v1749_v32  ;;  %v274_v32 = vadd.f32 %v2825_v56, %v3033_v18  ;;  %3498 = vst [vmem:[#allocation14_spill] sm:$0xff] %v3105_v26  ;;  %v349_v25 = vadd.f32 %v3001_v40, %v317_v20  ;;  %v3122_v40 = vpop.trf.xlu2 }
 0x213   :  { %v3092_v31 = vpop.f32.mrf.mxu3  ;;  %v604_v38 = vadd.f32 %v603_v59, %v572_v30  ;;  %v318_v59 = vmax.f32 %v272_v39, 0.0  ;;  %v279_v30 = vadd.f32 %v2825_v56, %v278_v21  ;;  %v801_v21 = vadd.f32 %v2825_v56, %v3035_v28 }
 0x214   :  { %v3094_v12 = vpop.f32.mrf.mxu2  ;;  %v319_v57 = vmax.f32 %v274_v32, 0.0 }
 0x215   :  { %v286_v9 = vpop.f32.mrf.mxu0  ;;  %v350_v18 = vadd.f32 %v349_v25, %v318_v59  ;;  %v1070_v59 = vadd.f32 %v2825_v56, %v3044_v17 }
 0x216   :  { %v509_v22 = vpop.f32.mrf.mxu1 }
 0x217   :  { %v510_v24 = vadd.f32 %v2825_v56, %v509_v22  ;;  %v320_v22 = vmax.f32 %v277_v45, 0.0  ;;  %v351_v46 = vadd.f32 %v350_v18, %v319_v57  ;;  %v1072_v18 = vadd.f32 %v2825_v56, %v3057_v48 }
 0x218   :  { %v3101_v62 = vpop.trf.xlu0 }
 0x219   :  { %v573_v11 = vmax.f32 %v510_v24, 0.0  ;;  %v282_v24 = vadd.f32 %v2825_v56, %v281_v1  ;;  %v1067_v1 = vadd.f32 %v2825_v56, %v3031_v16  ;;  %v352_v20 = vadd.f32 %v351_v46, %v320_v22 }
 0x21a   :  { %v804_v16 = vadd.f32 %v2825_v56, %v3048_v29  ;;  %v806_v29 = vadd.f32 %v2825_v56, %v3059_v3 }
 0x21b   :  { %v3107_v6 = vpop.f32.mrf.mxu3  ;;  %v605_v0 = vadd.f32 %v604_v38, %v573_v11  ;;  %v321_v38 = vmax.f32 %v279_v30, 0.0  ;;  %v284_v11 = vadd.f32 %v2825_v56, %v283_v13  ;;  %v3132_v13 = vpop.trf.xlu1  ;;  %v322_v32 = vmax.f32 %v282_v24, 0.0 }
 0x21c   :  { %v3111_v51 = vpop.f32.mrf.mxu2  ;;  %v849_v30 = vmax.f32 %v801_v21, 0.0  ;;  %v1116_v24 = vmax.f32 %v1070_v59, 0.0  ;;  %v850_v46 = vmax.f32 %v804_v16, 0.0  ;;  %v2019_v16 = vpop.trf.xlu2 }
 0x21d   :  { %v288_v23 = vpop.f32.mrf.mxu0  ;;  %v353_v25 = vadd.f32 %v352_v20, %v321_v38  ;;  %v3156_v20 = vld [vmem:[%s3493_s2] ss:$0 sm:$0xff] }
 0x21e   :  { %v512_v52 = vpop.f32.mrf.mxu1  ;;  %v289_v57 = vadd.f32 %v2825_v56, %v288_v23  ;;  %v809_v3 = vadd.f32 %v3156_v20, %v3071_v2 }
 0x21f   :  { %v513_v26 = vadd.f32 %v2825_v56, %v512_v52  ;;  %v1115_v52 = vmax.f32 %v1067_v1, 0.0  ;;  %v1117_v1 = vmax.f32 %v1072_v18, 0.0 }
 0x220   :  { %2548 = vmatmul.msk.bf16.gmra.mxu3 %vm154_vm1, %v2017_v53  ;;  %v1219_v39 = vpop.trf.xlu0 }
 0x221   :  { %v574_v34 = vmax.f32 %v513_v26, 0.0  ;;  %2364 = vmatmul.msk.bf16.gmra.mxu1 %vm154_vm1, %v2934_v47  ;;  %2452 = vmatmul.msk.bf16.gmra.mxu0 %vm154_vm1, %v1219_v39  ;;  %v287_v47 = vadd.f32 %v2825_v56, %v286_v9  ;;  %v1075_v39 = vadd.f32 %v2825_v56, %v3069_v60  ;;  %v1147_v21 = vadd.f32 %v3022_v7, %v1115_v52 }
 0x222   :  { %2516 = vmatmul.msk.bf16.gmra.mxu2 %vm154_vm1, %v3066_v55  ;;  %v323_v55 = vmax.f32 %v284_v11, 0.0  ;;  %v325_v11 = vmax.f32 %v289_v57, 0.0  ;;  %v811_v52 = vadd.f32 %v3156_v20, %v3080_v63 }
 0x223   :  { %v3130_v53 = vpop.f32.mrf.mxu3  ;;  %v606_v26 = vadd.f32 %v605_v0, %v574_v34  ;;  %v354_v34 = vadd.f32 %v353_v25, %v322_v32  ;;  %v324_v0 = vmax.f32 %v287_v47, 0.0  ;;  %v881_v32 = vadd.f32 %v3027_v58, %v849_v30  ;;  %v3163_v7 = vpop.trf.xlu1 }
 0x224   :  { %v3137_v28 = vpop.f32.mrf.mxu2  ;;  %v1148_v25 = vadd.f32 %v1147_v21, %v1116_v24  ;;  %v1118_v57 = vmax.f32 %v1075_v39, 0.0  ;;  %v1082_v24 = vadd.f32 %v3156_v20, %v3107_v6 }
 0x225   :  { %v291_v45 = vpop.f32.mrf.mxu0  ;;  %v355_v38 = vadd.f32 %v354_v34, %v323_v55  ;;  %v851_v55 = vmax.f32 %v806_v29, 0.0 }
 0x226   :  { %v514_v9 = vpop.f32.mrf.mxu1  ;;  %v292_v17 = vadd.f32 %v2825_v56, %v291_v45  ;;  %v1149_v30 = vadd.f32 %v1148_v25, %v1117_v1 }
 0x227   :  { %v515_v22 = vadd.f32 %v2825_v56, %v514_v9  ;;  %v1077_v56 = vadd.f32 %v3156_v20, %v3078_v14  ;;  %v356_v47 = vadd.f32 %v355_v38, %v324_v0  ;;  %v882_v9 = vadd.f32 %v881_v32, %v850_v46 }
 0x228   :  { %v3150_v23 = vpop.trf.xlu0  ;;  %v326_v59 = vmax.f32 %v292_v17, 0.0  ;;  %v1080_v14 = vadd.f32 %v3156_v20, %v3092_v31  ;;  %v814_v17 = vadd.f32 %v3156_v20, %v3094_v12  ;;  %v1150_v46 = vadd.f32 %v1149_v30, %v1118_v57 }
 0x229   :  { %v575_v48 = vmax.f32 %v515_v22, 0.0  ;;  %v357_v34 = vadd.f32 %v356_v47, %v325_v11  ;;  %v1119_v0 = vmax.f32 %v1077_v56, 0.0  ;;  %v883_v31 = vadd.f32 %v882_v9, %v851_v55 }
 0x22a   :  { %v853_v38 = vmax.f32 %v811_v52, 0.0  ;;  %v816_v11 = vadd.f32 %v3156_v20, %v3111_v51  ;;  %v1120_v21 = vmax.f32 %v1080_v14, 0.0  ;;  %v1085_v12 = vadd.f32 %v3156_v20, %v3130_v53 }
 0x22b   :  { %v1086_v60 = vpop.f32.mrf.mxu3  ;;  %v607_v45 = vadd.f32 %v606_v26, %v575_v48  ;;  %v852_v26 = vmax.f32 %v809_v3, 0.0  ;;  %v358_v63 = vadd.f32 %v357_v34, %v326_v59  ;;  %v1151_v56 = vadd.f32 %v1150_v46, %v1119_v0 }
 0x22c   :  { %v820_v2 = vpop.f32.mrf.mxu2  ;;  %v854_v32 = vmax.f32 %v814_v17, 0.0  ;;  %v819_v47 = vadd.f32 %v3156_v20, %v3137_v28  ;;  %v1121_v59 = vmax.f32 %v1082_v24, 0.0  ;;  %v1087_v53 = vadd.f32 %v3156_v20, %v1086_v60  ;;  %v3190_v28 = vpop.trf.xlu1 }
 0x22d   :  { %v293_v18 = vpop.f32.mrf.mxu0  ;;  %v884_v6 = vadd.f32 %v883_v31, %v852_v26  ;;  %v855_v57 = vmax.f32 %v816_v11, 0.0  ;;  %v1122_v9 = vmax.f32 %v1085_v12, 0.0 }
 0x22e   :  { %v294_v58 = vadd.f32 %v3156_v20, %v293_v18  ;;  %v517_v22 = vpop.f32.mrf.mxu1  ;;  %v1152_v18 = vadd.f32 %v1151_v56, %v1120_v21 }
 0x22f   :  { %v518_v39 = vadd.f32 %v3156_v20, %v517_v22  ;;  %v885_v55 = vadd.f32 %v884_v6, %v853_v38 }
 0x230   :  { %v327_v29 = vmax.f32 %v294_v58, 0.0  ;;  %2549 = vmatmul.msk.bf16.gmra.mxu3 %vm154_vm1, %v2019_v16  ;;  %v1221_v48 = vpop.trf.xlu0  ;;  %v1153_v0 = vadd.f32 %v1152_v18, %v1121_v59 }
 0x231   :  { %v576_v3 = vmax.f32 %v518_v39, 0.0  ;;  %2365 = vmatmul.msk.bf16.gmra.mxu1 %vm154_vm1, %v2954_v44  ;;  %2453 = vmatmul.msk.bf16.gmra.mxu0 %vm154_vm1, %v1221_v48  ;;  %v821_v44 = vadd.f32 %v3156_v20, %v820_v2  ;;  %v886_v58 = vadd.f32 %v885_v55, %v854_v32 }
 0x232   :  { %v359_v1 = vadd.f32 %v358_v63, %v327_v29  ;;  %2517 = vmatmul.msk.bf16.gmra.mxu2 %vm154_vm1, %v3089_v33  ;;  %v856_v33 = vmax.f32 %v819_v47, 0.0  ;;  %v1154_v24 = vadd.f32 %v1153_v0, %v1122_v9 }
 0x233   :  { %v1089_v51 = vpop.f32.mrf.mxu3  ;;  %v608_v25 = vadd.f32 %v607_v45, %v576_v3  ;;  %v1123_v45 = vmax.f32 %v1087_v53, 0.0  ;;  %v887_v22 = vadd.f32 %v886_v58, %v855_v57  ;;  %v857_v2 = vmax.f32 %v821_v44, 0.0 }
 0x234   :  { %v360_v16 = vrot.slane %v359_v1, 4  ;;  %v823_v52 = vpop.f32.mrf.mxu2  ;;  %v1090_v34 = vadd.f32 %v3156_v20, %v1089_v51 }
 0x235   :  { %v824_v30 = vadd.f32 %v3156_v20, %v823_v52  ;;  %v888_v31 = vadd.f32 %v887_v22, %v856_v33  ;;  %v1155_v48 = vadd.f32 %v1154_v24, %v1123_v45 }
 0x236   :  { %v361_v14 = vadd.f32 %v360_v16, %v359_v1  ;;  %v519_v26 = vpop.f32.mrf.mxu1  ;;  %v1124_v29 = vmax.f32 %v1090_v34, 0.0  ;;  %v328_v1 = vld [vmem:[#allocation2] sm:$0x1] }
 0x237   :  { %v520_v17 = vadd.f32 %v3156_v20, %v519_v26  ;;  %v858_v46 = vmax.f32 %v824_v30, 0.0  ;;  %v889_v3 = vadd.f32 %v888_v31, %v857_v2 }
 0x238   :  { %v362_v60 = vrot.slane %v361_v14, 2  ;;  %v1156_v32 = vadd.f32 %v1155_v48, %v1124_v29 }
 0x239   :  { %v577_v39 = vmax.f32 %v520_v17, 0.0  ;;  %v890_v59 = vadd.f32 %v889_v3, %v858_v46  ;;  %v860_v3 = vld [vmem:[#allocation2 + $0x2] sm:$0x1] }
 0x23a   :  { %v363_v63 = vadd.f32 %v362_v60, %v361_v14 }
 0x23b   :  { %v1091_v38 = vpop.f32.mrf.mxu3  ;;  %v609_v21 = vadd.f32 %v608_v25, %v577_v39  ;;  %v3199_v25 = vpop.trf.xlu1 }
 0x23c   :  { %v364_v11 = vrot.slane %v363_v63, 1  ;;  %v1092_v12 = vadd.f32 %v3156_v20, %v1091_v38  ;;  %v825_v6 = vpop.f32.mrf.mxu2  ;;  %v1126_v38 = vld [vmem:[#allocation2 + $0x3] sm:$0x1] }
 0x23d   :  { %v826_v47 = vadd.f32 %v3156_v20, %v825_v6 }
 0x23e   :  { %v365_v56 = vadd.f32 %v364_v11, %v363_v63  ;;  %v1125_v51 = vmax.f32 %v1092_v12, 0.0  ;;  %v522_v16 = vpop.f32.mrf.mxu1  ;;  %v1280_v53 = vpop.f32.mrf.mxu0 }
 0x23f   :  { %v859_v57 = vmax.f32 %v826_v47, 0.0  ;;  %v523_v52 = vadd.f32 %v3156_v20, %v522_v16  ;;  %v1281_v34 = vadd.f32 %v3156_v20, %v1280_v53 }
 0x240   :  { %v366_v55 = vadd.f32 %v365_v56, %v328_v1  ;;  %v1157_v44 = vadd.f32 %v1156_v32, %v1125_v51  ;;  %2550 = vmatmul.msk.bf16.gmra.mxu3 %vm154_vm1, %v2939_v49 }
 0x241   :  { %v891_v18 = vadd.f32 %v890_v59, %v859_v57  ;;  %v578_v14 = vmax.f32 %v523_v52, 0.0  ;;  %2454 = vmatmul.msk.bf16.gmra.mxu0 %vm154_vm1, %v2976_v50  ;;  %2478 = vmatmul.msk.bf16.vlgmr.msrb.gmra.mxu1 %vm154_vm1, %v3132_v13  ;;  %v1360_v45 = vmax.f32 %v1281_v34, 0.0 }
 0x242   :  { %367 = vst [vmem:[#allocation2] sm:$0x1] %v366_v55  ;;  %v1158_v9 = vrot.slane %v1157_v44, 4  ;;  %2518 = vmatmul.msk.bf16.gmra.mxu2 %vm154_vm1, %v2936_v43 }
 0x243   :  { %v2078_v58 = vpop.f32.mrf.mxu3  ;;  %v892_v33 = vrot.slane %v891_v18, 4  ;;  %v610_v30 = vadd.f32 %v609_v21, %v578_v14  ;;  %v3211_v46 = vpop.trf.xlu1 }
 0x244   :  { %v1159_v49 = vadd.f32 %v1158_v9, %v1157_v44  ;;  %v2079_v63 = vadd.f32 %v3156_v20, %v2078_v58 }
 0x245   :  { %v893_v26 = vadd.f32 %v892_v33, %v891_v18  ;;  %v1812_v60 = vpop.f32.mrf.mxu2 }
 0x246   :  { %v1160_v0 = vrot.slane %v1159_v49, 2  ;;  %v524_v17 = vpop.f32.mrf.mxu1  ;;  %v1282_v22 = vpop.f32.mrf.mxu0  ;;  %v1813_v6 = vadd.f32 %v3156_v20, %v1812_v60  ;;  %v2158_v56 = vmax.f32 %v2079_v63, 0.0 }
 0x247   :  { %v894_v2 = vrot.slane %v893_v26, 2  ;;  %v525_v24 = vadd.f32 %v3156_v20, %v524_v17  ;;  %v1283_v13 = vadd.f32 %v3156_v20, %v1282_v22 }
 0x248   :  { %v1161_v50 = vadd.f32 %v1160_v0, %v1159_v49  ;;  %v1892_v9 = vmax.f32 %v1813_v6, 0.0 }
 0x249   :  { %v895_v29 = vadd.f32 %v894_v2, %v893_v26  ;;  %v579_v39 = vmax.f32 %v525_v24, 0.0  ;;  %v1361_v31 = vmax.f32 %v1283_v13, 0.0 }
 0x24a   :  { %v1162_v43 = vrot.slane %v1161_v50, 1 }
 0x24b   :  { %v2080_v11 = vpop.f32.mrf.mxu3  ;;  %v896_v48 = vrot.slane %v895_v29, 1  ;;  %v611_v12 = vadd.f32 %v610_v30, %v579_v39  ;;  %v1393_v1 = vadd.f32 %v1361_v31, %v1360_v45  ;;  %v3227_v60 = vpop.trf.xlu1 }
 0x24c   :  { %v1163_v21 = vadd.f32 %v1162_v43, %v1161_v50  ;;  %v2081_v32 = vadd.f32 %v3156_v20, %v2080_v11 }
 0x24d   :  { %v897_v47 = vadd.f32 %v896_v48, %v895_v29  ;;  %v1814_v59 = vpop.f32.mrf.mxu2 }
 0x24e   :  { %v1164_v51 = vadd.f32 %v1163_v21, %v1126_v38  ;;  %v1815_v16 = vadd.f32 %v3156_v20, %v1814_v59  ;;  %v2159_v53 = vmax.f32 %v2081_v32, 0.0  ;;  %v527_v55 = vpop.f32.mrf.mxu1  ;;  %v1285_v57 = vpop.f32.mrf.mxu0 }
 0x24f   :  { %v898_v44 = vadd.f32 %v897_v47, %v860_v3  ;;  %v528_v52 = vadd.f32 %v3156_v20, %v527_v55  ;;  %v1286_v18 = vadd.f32 %v3156_v20, %v1285_v57 }
 0x250   :  { %1165 = vst [vmem:[#allocation2 + $0x3] sm:$0x1] %v1164_v51  ;;  %2551 = vmatmul.msk.bf16.gmra.mxu3 %vm154_vm1, %v2961_v35  ;;  %v1893_v14 = vmax.f32 %v1815_v16, 0.0  ;;  %v2191_v34 = vadd.f32 %v2159_v53, %v2158_v56 }
 0x251   :  { %899 = vst [vmem:[#allocation2 + $0x2] sm:$0x1] %v898_v44  ;;  %v580_v58 = vmax.f32 %v528_v52, 0.0  ;;  %v1362_v33 = vmax.f32 %v1286_v18, 0.0  ;;  %2455 = vmatmul.msk.bf16.gmra.mxu0 %vm154_vm1, %v2999_v36  ;;  %2479 = vmatmul.msk.bf16.gmra.mxu1 %vm154_vm1, %v3190_v28 }
 0x252   :  { %v1925_v49 = vadd.f32 %v1893_v14, %v1892_v9  ;;  %2519 = vmatmul.msk.bf16.gmra.mxu2 %vm154_vm1, %v2956_v15 }
 0x253   :  { %v2083_v30 = vpop.f32.mrf.mxu3  ;;  %v612_v26 = vadd.f32 %v611_v12, %v580_v58  ;;  %v1394_v0 = vadd.f32 %v1393_v1, %v1362_v33  ;;  %v1479_v21 = vpop.trf.xlu1 }
 0x254   :  { %v2084_v35 = vadd.f32 %v3156_v20, %v2083_v30 }
 0x255   :  { %v1817_v45 = vpop.f32.mrf.mxu2 }
 0x256   :  { %v2160_v17 = vmax.f32 %v2084_v35, 0.0  ;;  %v1818_v22 = vadd.f32 %v3156_v20, %v1817_v45  ;;  %v529_v2 = vpop.f32.mrf.mxu1  ;;  %v1287_v36 = vpop.f32.mrf.mxu0 }
 0x257   :  { %v530_v28 = vadd.f32 %v3156_v20, %v529_v2  ;;  %v1288_v24 = vadd.f32 %v3156_v20, %v1287_v36 }
 0x258   :  { %v2192_v50 = vadd.f32 %v2191_v34, %v2160_v17  ;;  %v1894_v13 = vmax.f32 %v1818_v22, 0.0 }
 0x259   :  { %v581_v15 = vmax.f32 %v530_v28, 0.0  ;;  %v1363_v63 = vmax.f32 %v1288_v24, 0.0 }
 0x25a   :  { %v1926_v29 = vadd.f32 %v1925_v49, %v1894_v13 }
 0x25b   :  { %v2085_v43 = vpop.f32.mrf.mxu3  ;;  %v613_v39 = vadd.f32 %v612_v26, %v581_v15  ;;  %v1395_v31 = vadd.f32 %v1394_v0, %v1363_v63  ;;  %v3251_v34 = vpop.trf.xlu1 }
 0x25c   :  { %v2086_v38 = vadd.f32 %v3156_v20, %v2085_v43 }
 0x25d   :  { %v1819_v11 = vpop.f32.mrf.mxu2 }
 0x25e   :  { %v2161_v48 = vmax.f32 %v2086_v38, 0.0  ;;  %v1820_v12 = vadd.f32 %v3156_v20, %v1819_v11  ;;  %v532_v1 = vpop.f32.mrf.mxu1  ;;  %v1290_v3 = vpop.f32.mrf.mxu0 }
 0x25f   :  { %v533_v56 = vadd.f32 %v3156_v20, %v532_v1  ;;  %v1291_v32 = vadd.f32 %v3156_v20, %v1290_v3 }
 0x260   :  { %v2193_v6 = vadd.f32 %v2192_v50, %v2161_v48  ;;  %2552 = vmatmul.msk.bf16.gmra.mxu3 %vm154_vm1, %v2989_v10  ;;  %v1895_v47 = vmax.f32 %v1820_v12, 0.0 }
 0x261   :  { %v582_v51 = vmax.f32 %v533_v56, 0.0  ;;  %v1364_v59 = vmax.f32 %v1291_v32, 0.0  ;;  %2456 = vmatmul.msk.bf16.gmra.mxu0 %vm154_vm1, %v3025_v8  ;;  %2480 = vmatmul.msk.bf16.gmra.mxu1 %vm154_vm1, %v3211_v46 }
 0x262   :  { %v1927_v16 = vadd.f32 %v1926_v29, %v1895_v47  ;;  %2520 = vmatmul.msk.bf16.gmra.mxu2 %vm154_vm1, %v2978_v54 }
 0x263   :  { %v2088_v53 = vpop.f32.mrf.mxu3  ;;  %v3244_v55 = vadd.f32 %v613_v39, %v582_v51  ;;  %v1396_v57 = vadd.f32 %v1395_v31, %v1364_v59  ;;  %v1481_v24 = vpop.trf.xlu1 }
 0x264   :  { %v2089_v44 = vadd.f32 %v3156_v20, %v2088_v53 }
 0x265   :  { %v1822_v10 = vpop.f32.mrf.mxu2 }
 0x266   :  { %v2162_v52 = vmax.f32 %v2089_v44, 0.0  ;;  %v1823_v18 = vadd.f32 %v3156_v20, %v1822_v10  ;;  %v3248_v9 = vpop.f32.mrf.mxu1  ;;  %v1292_v8 = vpop.f32.mrf.mxu0 }
 0x267   :  { %v1293_v46 = vadd.f32 %v3156_v20, %v1292_v8 }
 0x268   :  { %v2194_v14 = vadd.f32 %v2193_v6, %v2162_v52  ;;  %v1896_v58 = vmax.f32 %v1823_v18, 0.0 }
 0x269   :  { %v1365_v54 = vmax.f32 %v1293_v46, 0.0 }
 0x26a   :  { %v1928_v33 = vadd.f32 %v1927_v16, %v1896_v58 }
 0x26b   :  { %v2090_v49 = vpop.f32.mrf.mxu3  ;;  %v1397_v30 = vadd.f32 %v1396_v57, %v1365_v54  ;;  %v3271_v6 = vpop.trf.xlu1 }
 0x26c   :  { %v2091_v26 = vadd.f32 %v3156_v20, %v2090_v49 }
 0x26d   :  { %v1824_v0 = vpop.f32.mrf.mxu2 }
 0x26e   :  { %v2163_v35 = vmax.f32 %v2091_v26, 0.0  ;;  %v1825_v45 = vadd.f32 %v3156_v20, %v1824_v0  ;;  %v3255_v17 = vpop.f32.mrf.mxu1  ;;  %v1295_v22 = vpop.f32.mrf.mxu0 }
 0x26f   :  { %v1296_v36 = vadd.f32 %v3156_v20, %v1295_v22 }
 0x270   :  { %v2195_v2 = vadd.f32 %v2194_v14, %v2163_v35  ;;  %2553 = vmatmul.msk.bf16.gmra.mxu3 %vm154_vm1, %v3020_v5  ;;  %v1897_v50 = vmax.f32 %v1825_v45, 0.0 }
 0x271   :  { %v1366_v28 = vmax.f32 %v1296_v36, 0.0  ;;  %2457 = vmatmul.msk.bf16.gmra.mxu0 %vm154_vm1, %v3051_v41  ;;  %2481 = vmatmul.msk.bf16.gmra.mxu1 %vm154_vm1, %v1479_v21 }
 0x272   :  { %v1929_v13 = vadd.f32 %v1928_v33, %v1897_v50  ;;  %2521 = vmatmul.msk.bf16.gmra.mxu2 %vm154_vm1, %v3003_v37 }
 0x273   :  { %v2093_v15 = vpop.f32.mrf.mxu3  ;;  %v1398_v63 = vadd.f32 %v1397_v30, %v1366_v28  ;;  %v1483_v46 = vpop.trf.xlu1 }
 0x274   :  { %v2094_v29 = vadd.f32 %v3156_v20, %v2093_v15 }
 0x275   :  { %v1827_v43 = vpop.f32.mrf.mxu2 }
 0x276   :  { %v2164_v39 = vmax.f32 %v2094_v29, 0.0  ;;  %v1828_v5 = vadd.f32 %v3156_v20, %v1827_v43  ;;  %v3267_v31 = vpop.f32.mrf.mxu1  ;;  %v1297_v38 = vpop.f32.mrf.mxu0 }
 0x277   :  { %v1298_v41 = vadd.f32 %v3156_v20, %v1297_v38 }
 0x278   :  { %v2196_v11 = vadd.f32 %v2195_v2, %v2164_v39  ;;  %v1898_v48 = vmax.f32 %v1828_v5, 0.0 }
 0x279   :  { %v1367_v21 = vmax.f32 %v1298_v41, 0.0 }
 0x27a   :  { %v1930_v12 = vadd.f32 %v1929_v13, %v1898_v48 }
 0x27b   :  { %v2095_v1 = vpop.f32.mrf.mxu3  ;;  %v1399_v3 = vadd.f32 %v1398_v63, %v1367_v21  ;;  %v3296_v15 = vpop.trf.xlu1 }
 0x27c   :  { %v2096_v37 = vadd.f32 %v3156_v20, %v2095_v1 }
 0x27d   :  { %v1829_v56 = vpop.f32.mrf.mxu2 }
 0x27e   :  { %v2165_v32 = vmax.f32 %v2096_v37, 0.0  ;;  %v1830_v47 = vadd.f32 %v3156_v20, %v1829_v56  ;;  %v3274_v51 = vpop.f32.mrf.mxu1  ;;  %v1300_v59 = vpop.f32.mrf.mxu0 }
 0x27f   :  { %v1301_v53 = vadd.f32 %v3156_v20, %v1300_v59 }
 0x280   :  { %v2197_v16 = vadd.f32 %v2196_v11, %v2165_v32  ;;  %2554 = vmatmul.msk.bf16.gmra.mxu3 %vm154_vm1, %v3053_v61  ;;  %v1899_v57 = vmax.f32 %v1830_v47, 0.0 }
 0x281   :  { %2458 = vmatmul.msk.bf16.gmra.mxu0 %vm154_vm1, %v3074_v4  ;;  %2482 = vmatmul.msk.bf16.gmra.mxu1 %vm154_vm1, %v1481_v24  ;;  %v1368_v52 = vmax.f32 %v1301_v53, 0.0  ;;  %v535_v53 = vadd.f32 %v3156_v20, %v3248_v9 }
 0x282   :  { %v1931_v44 = vadd.f32 %v1930_v12, %v1899_v57  ;;  %2522 = vmatmul.msk.bf16.gmra.mxu2 %vm154_vm1, %v3029_v27 }
 0x283   :  { %v2098_v10 = vpop.f32.mrf.mxu3  ;;  %v1400_v33 = vadd.f32 %v1399_v3, %v1368_v52  ;;  %v1485_v37 = vpop.trf.xlu1  ;;  %v583_v9 = vmax.f32 %v535_v53, 0.0 }
 0x284   :  { %v2099_v18 = vadd.f32 %v3156_v20, %v2098_v10 }
 0x285   :  { %v1832_v8 = vpop.f32.mrf.mxu2 }
 0x286   :  { %v2166_v14 = vmax.f32 %v2099_v18, 0.0  ;;  %v1833_v58 = vadd.f32 %v3156_v20, %v1832_v8  ;;  %v3286_v61 = vpop.f32.mrf.mxu1  ;;  %v1302_v54 = vpop.f32.mrf.mxu0  ;;  %v538_v8 = vadd.f32 %v3156_v20, %v3255_v17 }
 0x287   :  { %v1303_v49 = vadd.f32 %v3156_v20, %v1302_v54 }
 0x288   :  { %v2198_v4 = vadd.f32 %v2197_v16, %v2166_v14  ;;  %v1900_v30 = vmax.f32 %v1833_v58, 0.0  ;;  %v540_v58 = vadd.f32 %v3156_v20, %v3267_v31  ;;  %v545_v31 = vadd.f32 %v3156_v20, %v3286_v61 }
 0x289   :  { %v1369_v26 = vmax.f32 %v1303_v49, 0.0 }
 0x28a   :  { %v1932_v0 = vadd.f32 %v1931_v44, %v1900_v30  ;;  %v584_v30 = vmax.f32 %v538_v8, 0.0  ;;  %v3500_v8 = vld [vmem:[#allocation14_spill] sm:$0xff] }
 0x28b   :  { %v2100_v27 = vpop.f32.mrf.mxu3  ;;  %v1401_v35 = vadd.f32 %v1400_v33, %v1369_v26  ;;  %v3499_v33 = vld [vmem:[#allocation13_spill] sm:$0xff]  ;;  %v3323_v17 = vpop.trf.xlu1 }
 0x28c   :  { %v2101_v45 = vadd.f32 %v3156_v20, %v2100_v27  ;;  %v615_v27 = vadd.f32 %v3244_v55, %v583_v9  ;;  %v587_v55 = vmax.f32 %v545_v31, 0.0 }
 0x28d   :  { %v1834_v22 = vpop.f32.mrf.mxu2 }
 0x28e   :  { %v2167_v2 = vmax.f32 %v2101_v45, 0.0  ;;  %v1835_v36 = vadd.f32 %v3156_v20, %v1834_v22  ;;  %v3291_v50 = vpop.f32.mrf.mxu1  ;;  %v1305_v28 = vpop.f32.mrf.mxu0 }
 0x28f   :  { %v1306_v13 = vadd.f32 %v3156_v20, %v1305_v28 }
 0x290   :  { %v2199_v24 = vadd.f32 %v2198_v4, %v2167_v2  ;;  %2555 = vmatmul.msk.bf16.gmra.mxu3 %vm154_vm1, %v3082_v19  ;;  %v1901_v63 = vmax.f32 %v1835_v36, 0.0 }
 0x291   :  { %v1370_v29 = vmax.f32 %v1306_v13, 0.0  ;;  %2459 = vmatmul.msk.bf16.gmra.mxu0 %vm154_vm1, %v3101_v62  ;;  %2483 = vmatmul.msk.bf16.gmra.mxu1 %vm154_vm1, %v1483_v46 }
 0x292   :  { %v1933_v43 = vadd.f32 %v1932_v0, %v1901_v63  ;;  %2523 = vmatmul.msk.bf16.gmra.mxu2 %vm154_vm1, %v3055_v42 }
 0x293   :  { %v2103_v39 = vpop.f32.mrf.mxu3  ;;  %v1402_v5 = vadd.f32 %v1401_v35, %v1370_v29  ;;  %v585_v35 = vmax.f32 %v540_v58, 0.0 }
 0x294   :  { %v2104_v38 = vadd.f32 %v3156_v20, %v2103_v39 }
 0x295   :  { %v1837_v11 = vpop.f32.mrf.mxu2 }
 0x296   :  { %v2168_v41 = vmax.f32 %v2104_v38, 0.0  ;;  %v1838_v19 = vadd.f32 %v3156_v20, %v1837_v11  ;;  %v549_v48 = vpop.f32.mrf.mxu1  ;;  %v1307_v21 = vpop.f32.mrf.mxu0 }
 0x297   :  { %v1308_v1 = vadd.f32 %v3156_v20, %v1307_v21  ;;  %v550_v61 = vadd.f32 %v3156_v20, %v549_v48  ;;  %v2020_v21 = vpop.trf.xlu2 }
 0x298   :  { %v2200_v12 = vadd.f32 %v2199_v24, %v2168_v41  ;;  %v1902_v62 = vmax.f32 %v1838_v19, 0.0  ;;  %v616_v24 = vadd.f32 %v615_v27, %v584_v30  ;;  %v1222_v19 = vpop.trf.xlu0 }
 0x299   :  { %v1371_v3 = vmax.f32 %v1308_v1, 0.0 }
 0x29a   :  { %v1934_v56 = vadd.f32 %v1933_v43, %v1902_v62  ;;  %v617_v43 = vadd.f32 %v616_v24, %v585_v35 }
 0x29b   :  { %v2105_v32 = vpop.f32.mrf.mxu3  ;;  %v1403_v47 = vadd.f32 %v1402_v5, %v1371_v3 }
 0x29c   :  { %v2106_v42 = vadd.f32 %v3156_v20, %v2105_v32 }
 0x29d   :  { %v1839_v59 = vpop.f32.mrf.mxu2 }
 0x29e   :  { %v2169_v16 = vmax.f32 %v2106_v42, 0.0  ;;  %v1840_v57 = vadd.f32 %v3156_v20, %v1839_v59  ;;  %v552_v44 = vpop.f32.mrf.mxu1  ;;  %v1310_v10 = vpop.f32.mrf.mxu0  ;;  %v589_v42 = vmax.f32 %v550_v61, 0.0 }
 0x29f   :  { %v1311_v18 = vadd.f32 %v3156_v20, %v1310_v10  ;;  %v553_v1 = vadd.f32 %v3156_v20, %v552_v44 }
 0x2a0   :  { %v2201_v52 = vadd.f32 %v2200_v12, %v2169_v16  ;;  %2556 = vmatmul.msk.bf16.gmra.mxu3 %vm154_vm1, %v3122_v40  ;;  %v1903_v14 = vmax.f32 %v1840_v57, 0.0 }
 0x2a1   :  { %v1372_v46 = vmax.f32 %v1311_v18, 0.0  ;;  %2460 = vmatmul.msk.bf16.gmra.mxu0 %vm154_vm1, %v3150_v23  ;;  %2484 = vmatmul.msk.bf16.gmra.mxu1 %vm154_vm1, %v1485_v37  ;;  %v543_v23 = vadd.f32 %v3156_v20, %v3274_v51  ;;  %v548_v51 = vadd.f32 %v3156_v20, %v3291_v50  ;;  %v1487_v37 = vpop.trf.xlu1  ;;  %v590_v10 = vmax.f32 %v553_v1, 0.0 }
 0x2a2   :  { %v1935_v54 = vadd.f32 %v1934_v56, %v1903_v14  ;;  %2524 = vmatmul.msk.bf16.gmra.mxu2 %vm154_vm1, %v3499_v33 }
 0x2a3   :  { %v2108_v4 = vpop.f32.mrf.mxu3  ;;  %v1404_v40 = vadd.f32 %v1403_v47, %v1372_v46  ;;  %v586_v13 = vmax.f32 %v543_v23, 0.0  ;;  %v588_v12 = vmax.f32 %v548_v51, 0.0 }
 0x2a4   :  { %v2109_v49 = vadd.f32 %v3156_v20, %v2108_v4 }
 0x2a5   :  { %v1842_v26 = vpop.f32.mrf.mxu2  ;;  %v618_v41 = vadd.f32 %v617_v43, %v586_v13  ;;  %v2250_v13 = vld [vmem:[#allocation8 + $0x78] sm:$0xff] }
 0x2a6   :  { %v2170_v0 = vmax.f32 %v2109_v49, 0.0  ;;  %v1843_v45 = vadd.f32 %v3156_v20, %v1842_v26  ;;  %v554_v22 = vpop.f32.mrf.mxu1  ;;  %v1312_v2 = vpop.f32.mrf.mxu0  ;;  %2255 = vmatpush.msra.mxu0 %v2250_v13 }
 0x2a7   :  { %v1313_v28 = vadd.f32 %v3156_v20, %v1312_v2  ;;  %v619_v50 = vadd.f32 %v618_v41, %v587_v55  ;;  %v555_v48 = vadd.f32 %v3156_v20, %v554_v22 }
 0x2a8   :  { %v2202_v36 = vadd.f32 %v2201_v52, %v2170_v0  ;;  %v1904_v63 = vmax.f32 %v1843_v45, 0.0 }
 0x2a9   :  { %v1373_v29 = vmax.f32 %v1313_v28, 0.0  ;;  %v620_v57 = vadd.f32 %v619_v50, %v588_v12  ;;  %v591_v9 = vmax.f32 %v555_v48, 0.0 }
 0x2aa   :  { %v1936_v39 = vadd.f32 %v1935_v54, %v1904_v63 }
 0x2ab   :  { %v2110_v5 = vpop.f32.mrf.mxu3  ;;  %v1405_v38 = vadd.f32 %v1404_v40, %v1373_v29  ;;  %v621_v46 = vadd.f32 %v620_v57, %v589_v42 }
 0x2ac   :  { %v2111_v11 = vadd.f32 %v3156_v20, %v2110_v5 }
 0x2ad   :  { %v1844_v62 = vpop.f32.mrf.mxu2  ;;  %v622_v33 = vadd.f32 %v621_v46, %v590_v10 }
 0x2ae   :  { %v2171_v3 = vmax.f32 %v2111_v11, 0.0  ;;  %v1845_v56 = vadd.f32 %v3156_v20, %v1844_v62  ;;  %v557_v32 = vpop.f32.mrf.mxu1  ;;  %v1315_v47 = vpop.f32.mrf.mxu0 }
 0x2af   :  { %v1316_v16 = vadd.f32 %v3156_v20, %v1315_v47  ;;  %v558_v44 = vadd.f32 %v3156_v20, %v557_v32  ;;  %v623_v0 = vadd.f32 %v622_v33, %v591_v9  ;;  %v2249_v33 = vld [vmem:[#allocation8 + $0x70] sm:$0xff] }
 0x2b0   :  { %v2203_v59 = vadd.f32 %v2202_v36, %v2171_v3  ;;  %2557 = vmatmul.msk.bf16.gmra.mxu3 %vm154_vm1, %v2020_v21  ;;  %v1905_v53 = vmax.f32 %v1845_v56, 0.0  ;;  %2256 = vmatpush.msra.mxu0 %v2249_v33 }
 0x2b1   :  { %v1374_v52 = vmax.f32 %v1316_v16, 0.0  ;;  %2461 = vmatmul.msk.bf16.gmra.mxu0 %vm154_vm1, %v1222_v19  ;;  %2485 = vmatmul.msk.bf16.gmra.mxu1 %vm154_vm1, %v1487_v37  ;;  %v592_v4 = vmax.f32 %v558_v44, 0.0 }
 0x2b2   :  { %v1937_v18 = vadd.f32 %v1936_v39, %v1905_v53  ;;  %2525 = vmatmul.msk.bf16.gmra.mxu2 %vm154_vm1, %v3500_v8 }
 0x2b3   :  { %v2113_v14 = vpop.f32.mrf.mxu3  ;;  %v1406_v58 = vadd.f32 %v1405_v38, %v1374_v52  ;;  %v624_v22 = vadd.f32 %v623_v0, %v592_v4 }
 0x2b4   :  { %v2114_v54 = vadd.f32 %v3156_v20, %v2113_v14 }
 0x2b5   :  { %v1847_v40 = vpop.f32.mrf.mxu2 }
 0x2b6   :  { %v2172_v49 = vmax.f32 %v2114_v54, 0.0  ;;  %v1848_v30 = vadd.f32 %v3156_v20, %v1847_v40  ;;  %v559_v23 = vpop.f32.mrf.mxu1  ;;  %v1317_v26 = vpop.f32.mrf.mxu0 }
 0x2b7   :  { %v560_v35 = vadd.f32 %v3156_v20, %v559_v23  ;;  %v1318_v31 = vadd.f32 %v3156_v20, %v1317_v26 }
 0x2b8   :  { %v2204_v27 = vadd.f32 %v2203_v59, %v2172_v49  ;;  %v1906_v45 = vmax.f32 %v1848_v30, 0.0  ;;  %v594_v59 = vld [vmem:[#allocation2 + $0x1] sm:$0x1] }
 0x2b9   :  { %v593_v2 = vmax.f32 %v560_v35, 0.0  ;;  %v1375_v36 = vmax.f32 %v1318_v31, 0.0 }
 0x2ba   :  { %v1938_v28 = vadd.f32 %v1937_v18, %v1906_v45 }
 0x2bb   :  { %v2115_v24 = vpop.f32.mrf.mxu3  ;;  %v625_v63 = vadd.f32 %v624_v22, %v593_v2  ;;  %v1407_v51 = vadd.f32 %v1406_v58, %v1375_v36 }
 0x2bc   :  { %v2116_v29 = vadd.f32 %v3156_v20, %v2115_v24 }
 0x2bd   :  { %v626_v43 = vrot.slane %v625_v63, 4  ;;  %v1849_v55 = vpop.f32.mrf.mxu2 }
 0x2be   :  { %v2173_v39 = vmax.f32 %v2116_v29, 0.0  ;;  %v1850_v5 = vadd.f32 %v3156_v20, %v1849_v55  ;;  %v1320_v61 = vpop.f32.mrf.mxu0  ;;  %v1546_v38 = vpop.f32.mrf.mxu1 }
 0x2bf   :  { %v627_v11 = vadd.f32 %v626_v43, %v625_v63  ;;  %v1321_v19 = vadd.f32 %v3156_v20, %v1320_v61  ;;  %v1547_v47 = vadd.f32 %v3156_v20, %v1546_v38 }
 0x2c0   :  { %v2205_v41 = vadd.f32 %v2204_v27, %v2173_v39  ;;  %v1907_v21 = vmax.f32 %v1850_v5, 0.0 }
 0x2c1   :  { %v628_v12 = vrot.slane %v627_v11, 2  ;;  %v1376_v1 = vmax.f32 %v1321_v19, 0.0  ;;  %2486 = vmatmul.msk.bf16.gmra.mxu1 %vm154_vm1, %v3163_v7  ;;  %v1626_v14 = vmax.f32 %v1547_v47, 0.0 }
 0x2c2   :  { %v1939_v62 = vadd.f32 %v1938_v28, %v1907_v21 }
 0x2c3   :  { %v2118_v3 = vpop.f32.mrf.mxu3  ;;  %v629_v37 = vadd.f32 %v628_v12, %v627_v11  ;;  %v1408_v50 = vadd.f32 %v1407_v51, %v1376_v1  ;;  %v2248_v1 = vld [vmem:[#allocation8 + $0x68] sm:$0xff] }
 0x2c4   :  { %v2119_v56 = vadd.f32 %v3156_v20, %v2118_v3  ;;  %2257 = vmatpush.msra.mxu0 %v2248_v1 }
 0x2c5   :  { %v630_v32 = vrot.slane %v629_v37, 1  ;;  %v1852_v42 = vpop.f32.mrf.mxu2 }
 0x2c6   :  { %v2174_v48 = vmax.f32 %v2119_v56, 0.0  ;;  %v1853_v16 = vadd.f32 %v3156_v20, %v1852_v42  ;;  %v1322_v53 = vpop.f32.mrf.mxu0  ;;  %v1548_v57 = vpop.f32.mrf.mxu1 }
 0x2c7   :  { %v631_v10 = vadd.f32 %v630_v32, %v629_v37  ;;  %v1323_v7 = vadd.f32 %v3156_v20, %v1322_v53  ;;  %v1549_v52 = vadd.f32 %v3156_v20, %v1548_v57 }
 0x2c8   :  { %v2206_v44 = vadd.f32 %v2205_v41, %v2174_v48  ;;  %v1908_v18 = vmax.f32 %v1853_v16, 0.0 }
 0x2c9   :  { %v632_v8 = vadd.f32 %v631_v10, %v594_v59  ;;  %v1377_v46 = vmax.f32 %v1323_v7, 0.0  ;;  %v1627_v9 = vmax.f32 %v1549_v52, 0.0 }
 0x2ca   :  { %v1940_v58 = vadd.f32 %v1939_v62, %v1908_v18 }
 0x2cb   :  { %v2120_v54 = vpop.f32.mrf.mxu3  ;;  %633 = vst [vmem:[#allocation2 + $0x1] sm:$0x1] %v632_v8  ;;  %v1409_v4 = vadd.f32 %v1408_v50, %v1377_v46  ;;  %v1659_v40 = vadd.f32 %v1627_v9, %v1626_v14 }
 0x2cc   :  { %v2121_v49 = vadd.f32 %v3156_v20, %v2120_v54 }
 0x2cd   :  { %v1854_v30 = vpop.f32.mrf.mxu2 }
 0x2ce   :  { %v2175_v23 = vmax.f32 %v2121_v49, 0.0  ;;  %v1855_v26 = vadd.f32 %v3156_v20, %v1854_v30  ;;  %v1325_v0 = vpop.f32.mrf.mxu0  ;;  %v1551_v27 = vpop.f32.mrf.mxu1 }
 0x2cf   :  { %v1326_v31 = vadd.f32 %v3156_v20, %v1325_v0  ;;  %v1552_v45 = vadd.f32 %v3156_v20, %v1551_v27 }
 0x2d0   :  { %v2207_v35 = vadd.f32 %v2206_v44, %v2175_v23  ;;  %v1909_v22 = vmax.f32 %v1855_v26, 0.0  ;;  %v2247_v23 = vld [vmem:[#allocation8 + $0x60] sm:$0xff] }
 0x2d1   :  { %v1378_v2 = vmax.f32 %v1326_v31, 0.0  ;;  %v1628_v36 = vmax.f32 %v1552_v45, 0.0  ;;  %2487 = vmatmul.msk.bf16.gmra.mxu1 %vm154_vm1, %v3199_v25  ;;  %2258 = vmatpush.msra.mxu0 %v2247_v23  ;;  %v3390_v31 = vld [vmem:[%s3493_s2] ss:$0 sm:$0xff] }
 0x2d2   :  { %v1941_v28 = vadd.f32 %v1940_v58, %v1909_v22 }
 0x2d3   :  { %v2123_v24 = vpop.f32.mrf.mxu3  ;;  %v1410_v13 = vadd.f32 %v1409_v4, %v1378_v2  ;;  %v1660_v63 = vadd.f32 %v1659_v40, %v1628_v36 }
 0x2d4   :  { %v2124_v51 = vadd.f32 %v3156_v20, %v2123_v24 }
 0x2d5   :  { %v1857_v29 = vpop.f32.mrf.mxu2 }
 0x2d6   :  { %v2176_v43 = vmax.f32 %v2124_v51, 0.0  ;;  %v1858_v55 = vadd.f32 %v3156_v20, %v1857_v29  ;;  %v1327_v39 = vpop.f32.mrf.mxu0  ;;  %v1553_v5 = vpop.f32.mrf.mxu1  ;;  %v2246_v29 = vld [vmem:[#allocation8 + $0x58] sm:$0xff] }
 0x2d7   :  { %v1328_v38 = vadd.f32 %v3156_v20, %v1327_v39  ;;  %v1554_v11 = vadd.f32 %v3156_v20, %v1553_v5  ;;  %2259 = vmatpush.msra.mxu0 %v2246_v29 }
 0x2d8   :  { %v2208_v61 = vadd.f32 %v2207_v35, %v2176_v43  ;;  %v1910_v41 = vmax.f32 %v1858_v55, 0.0 }
 0x2d9   :  { %v1379_v19 = vmax.f32 %v1328_v38, 0.0  ;;  %v1629_v25 = vmax.f32 %v1554_v11, 0.0 }
 0x2da   :  { %v1942_v21 = vadd.f32 %v1941_v28, %v1910_v41 }
 0x2db   :  { %v2125_v12 = vpop.f32.mrf.mxu3  ;;  %v1411_v62 = vadd.f32 %v1410_v13, %v1379_v19  ;;  %v1661_v3 = vadd.f32 %v1660_v63, %v1629_v25 }
 0x2dc   :  { %v2126_v37 = vadd.f32 %v3156_v20, %v2125_v12 }
 0x2dd   :  { %v1859_v50 = vpop.f32.mrf.mxu2 }
 0x2de   :  { %v2177_v56 = vmax.f32 %v2126_v37, 0.0  ;;  %v1860_v32 = vadd.f32 %v3156_v20, %v1859_v50  ;;  %v1330_v47 = vpop.f32.mrf.mxu0  ;;  %v1556_v42 = vpop.f32.mrf.mxu1 }
 0x2df   :  { %v1331_v59 = vadd.f32 %v3156_v20, %v1330_v47  ;;  %v1557_v16 = vadd.f32 %v3156_v20, %v1556_v42 }
 0x2e0   :  { %v2209_v48 = vadd.f32 %v2208_v61, %v2177_v56  ;;  %v1911_v53 = vmax.f32 %v1860_v32, 0.0 }
 0x2e1   :  { %v1380_v57 = vmax.f32 %v1331_v59, 0.0  ;;  %v1630_v10 = vmax.f32 %v1557_v16, 0.0  ;;  %2488 = vmatmul.msk.bf16.gmra.mxu1 %vm154_vm1, %v3227_v60 }
 0x2e2   :  { %v1943_v44 = vadd.f32 %v1942_v21, %v1911_v53 }
 0x2e3   :  { %v2128_v7 = vpop.f32.mrf.mxu3  ;;  %v3376_v52 = vadd.f32 %v1411_v62, %v1380_v57  ;;  %v1662_v18 = vadd.f32 %v1661_v3, %v1630_v10  ;;  %v2245_v62 = vld [vmem:[#allocation8 + $0x50] sm:$0xff] }
 0x2e4   :  { %v2129_v8 = vadd.f32 %v3156_v20, %v2128_v7  ;;  %2260 = vmatpush.msra.mxu0 %v2245_v62 }
 0x2e5   :  { %v1862_v14 = vpop.f32.mrf.mxu2 }
 0x2e6   :  { %v2178_v46 = vmax.f32 %v2129_v8, 0.0  ;;  %v1863_v9 = vadd.f32 %v3156_v20, %v1862_v14  ;;  %v3380_v58 = vpop.f32.mrf.mxu0  ;;  %v1558_v54 = vpop.f32.mrf.mxu1 }
 0x2e7   :  { %v1559_v4 = vadd.f32 %v3156_v20, %v1558_v54 }
 0x2e8   :  { %v3382_v33 = vadd.f32 %v2209_v48, %v2178_v46  ;;  %v1912_v40 = vmax.f32 %v1863_v9, 0.0 }
 0x2e9   :  { %v1631_v60 = vmax.f32 %v1559_v4, 0.0 }
 0x2ea   :  { %v3385_v49 = vadd.f32 %v1943_v44, %v1912_v40  ;;  %v2244_v44 = vld [vmem:[#allocation8 + $0x48] sm:$0xff] }
 0x2eb   :  { %v2130_v30 = vpop.f32.mrf.mxu3  ;;  %v1663_v26 = vadd.f32 %v1662_v18, %v1631_v60  ;;  %2261 = vmatpush.msra.mxu0 %v2244_v44 }
 0x2ec   :  { %v2131_v46 = vadd.f32 %v3390_v31, %v2130_v30 }
 0x2ed   :  { %v1864_v0 = vpop.f32.mrf.mxu2 }
 0x2ee   :  { %v1335_v27 = vpop.f32.mrf.mxu0  ;;  %v1561_v35 = vpop.f32.mrf.mxu1  ;;  %v1865_v54 = vadd.f32 %v3390_v31, %v1864_v0 }
 0x2ef   :  { %v1562_v45 = vadd.f32 %v3390_v31, %v1561_v35  ;;  %v1336_v4 = vadd.f32 %v3390_v31, %v1335_v27  ;;  %v2179_v35 = vmax.f32 %v2131_v46, 0.0 }
 0x2f1   :  { %v1632_v22 = vmax.f32 %v1562_v45, 0.0  ;;  %2489 = vmatmul.msk.bf16.gmra.mxu1 %vm154_vm1, %v3251_v34 }
 0x2f3   :  { %v2133_v20 = vpop.f32.mrf.mxu3  ;;  %v1664_v2 = vadd.f32 %v1663_v26, %v1632_v22  ;;  %v1913_v22 = vmax.f32 %v1865_v54, 0.0 }
 0x2f4   :  { %v2134_v26 = vadd.f32 %v3390_v31, %v2133_v20 }
 0x2f5   :  { %v1867_v36 = vpop.f32.mrf.mxu2 }
 0x2f6   :  { %v1337_v28 = vpop.f32.mrf.mxu0  ;;  %v1563_v24 = vpop.f32.mrf.mxu1  ;;  %v1868_v23 = vadd.f32 %v3390_v31, %v1867_v36 }
 0x2f7   :  { %v1564_v13 = vadd.f32 %v3390_v31, %v1563_v24  ;;  %v1338_v45 = vadd.f32 %v3390_v31, %v1337_v28  ;;  %v2211_v28 = vadd.f32 %v3382_v33, %v2179_v35 }
 0x2f8   :  { %v1914_v36 = vmax.f32 %v1868_v23, 0.0 }
 0x2f9   :  { %v1633_v63 = vmax.f32 %v1564_v13, 0.0 }
 0x2fb   :  { %v2135_v51 = vpop.f32.mrf.mxu3  ;;  %v1665_v43 = vadd.f32 %v1664_v2, %v1633_v63  ;;  %v1382_v2 = vmax.f32 %v1336_v4, 0.0  ;;  %v2180_v63 = vmax.f32 %v2134_v26, 0.0 }
 0x2fc   :  { %v2136_v0 = vadd.f32 %v3390_v31, %v2135_v51 }
 0x2fd   :  { %v1869_v55 = vpop.f32.mrf.mxu2  ;;  %v2212_v62 = vadd.f32 %v2211_v28, %v2180_v63 }
 0x2fe   :  { %v1340_v39 = vpop.f32.mrf.mxu0  ;;  %v1566_v5 = vpop.f32.mrf.mxu1  ;;  %v1870_v27 = vadd.f32 %v3390_v31, %v1869_v55  ;;  %v1945_v55 = vadd.f32 %v3385_v49, %v1913_v22 }
 0x2ff   :  { %v1567_v61 = vadd.f32 %v3390_v31, %v1566_v5  ;;  %v1341_v24 = vadd.f32 %v3390_v31, %v1340_v39  ;;  %v1383_v5 = vmax.f32 %v1338_v45, 0.0 }
 0x301   :  { %v1634_v38 = vmax.f32 %v1567_v61, 0.0  ;;  %2490 = vmatmul.msk.bf16.gmra.mxu1 %vm154_vm1, %v3271_v6 }
 0x303   :  { %v2138_v34 = vpop.f32.mrf.mxu3  ;;  %v1666_v11 = vadd.f32 %v1665_v43, %v1634_v38  ;;  %v2181_v38 = vmax.f32 %v2136_v0, 0.0 }
 0x304   :  { %v2139_v20 = vadd.f32 %v3390_v31, %v2138_v34 }
 0x305   :  { %v1872_v41 = vpop.f32.mrf.mxu2 }
 0x306   :  { %v1342_v19 = vpop.f32.mrf.mxu0  ;;  %v1568_v25 = vpop.f32.mrf.mxu1 }
 0x307   :  { %v1569_v21 = vadd.f32 %v3390_v31, %v1568_v25  ;;  %v1343_v61 = vadd.f32 %v3390_v31, %v1342_v19  ;;  %v1384_v25 = vmax.f32 %v1341_v24, 0.0 }
 0x309   :  { %v1635_v12 = vmax.f32 %v1569_v21, 0.0 }
 0x30b   :  { %v3400_v1 = vpop.f32.mrf.mxu3  ;;  %v1667_v3 = vadd.f32 %v1666_v11, %v1635_v12  ;;  %v1873_v11 = vadd.f32 %v3390_v31, %v1872_v41  ;;  %v1946_v12 = vadd.f32 %v1945_v55, %v1914_v36 }
 0x30c   :  { %v2141_v33 = vadd.f32 %v3390_v31, %v3400_v1 }
 0x30d   :  { %v3402_v37 = vpop.f32.mrf.mxu2 }
 0x30e   :  { %v1345_v50 = vpop.f32.mrf.mxu0  ;;  %v1571_v56 = vpop.f32.mrf.mxu1  ;;  %v1875_v1 = vadd.f32 %v3390_v31, %v3402_v37  ;;  %v2183_v46 = vmax.f32 %v2141_v33, 0.0 }
 0x30f   :  { %v1572_v32 = vadd.f32 %v3390_v31, %v1571_v56  ;;  %v1346_v21 = vadd.f32 %v3390_v31, %v1345_v50 }
 0x310   :  { %v1917_v22 = vmax.f32 %v1875_v1, 0.0 }
 0x311   :  { %v1636_v6 = vmax.f32 %v1572_v32, 0.0  ;;  %2491 = vmatmul.msk.bf16.gmra.mxu1 %vm154_vm1, %v3296_v15  ;;  %v1333_v15 = vadd.f32 %v3390_v31, %v3380_v58  ;;  %v1385_v32 = vmax.f32 %v1343_v61, 0.0 }
 0x313   :  { %v3407_v47 = vpop.f32.mrf.mxu3  ;;  %v1668_v42 = vadd.f32 %v1667_v3, %v1636_v6  ;;  %v1381_v60 = vmax.f32 %v1333_v15, 0.0  ;;  %v2182_v3 = vmax.f32 %v2139_v20, 0.0  ;;  %v1488_v15 = vpop.trf.xlu1  ;;  %v2242_v20 = vld [vmem:[#allocation8 + $0x38] sm:$0xff] }
 0x314   :  { %v2144_v41 = vadd.f32 %v3390_v31, %v3407_v47 }
 0x315   :  { %v3409_v48 = vpop.f32.mrf.mxu2 }
 0x316   :  { %v1347_v59 = vpop.f32.mrf.mxu0  ;;  %v1573_v16 = vpop.f32.mrf.mxu1  ;;  %v2184_v26 = vmax.f32 %v2144_v41, 0.0 }
 0x317   :  { %v1574_v53 = vadd.f32 %v3390_v31, %v1573_v16  ;;  %v1348_v49 = vadd.f32 %v3390_v31, %v1347_v59  ;;  %v1916_v16 = vmax.f32 %v1873_v11, 0.0 }
 0x319   :  { %v1637_v57 = vmax.f32 %v1574_v53, 0.0 }
 0x31b   :  { %v3412_v10 = vpop.f32.mrf.mxu3  ;;  %v1669_v7 = vadd.f32 %v1668_v42, %v1637_v57  ;;  %v2213_v42 = vadd.f32 %v2212_v62, %v2181_v38  ;;  %v1386_v57 = vmax.f32 %v1346_v21, 0.0 }
 0x31c   :  { %v2146_v59 = vadd.f32 %v3390_v31, %v3412_v10 }
 0x31d   :  { %v3414_v18 = vpop.f32.mrf.mxu2 }
 0x31e   :  { %v1350_v8 = vpop.f32.mrf.mxu0  ;;  %v1576_v14 = vpop.f32.mrf.mxu1  ;;  %v1880_v0 = vadd.f32 %v3390_v31, %v3414_v18 }
 0x31f   :  { %v1577_v9 = vadd.f32 %v3390_v31, %v1576_v14  ;;  %v1351_v44 = vadd.f32 %v3390_v31, %v1350_v8  ;;  %v2214_v14 = vadd.f32 %v2213_v42, %v2182_v3  ;;  %v1878_v8 = vadd.f32 %v3390_v31, %v3409_v48 }
 0x320   :  { %v1919_v38 = vmax.f32 %v1880_v0, 0.0  ;;  %v2241_v0 = vld [vmem:[#allocation8 + $0x30] sm:$0xff] }
 0x321   :  { %v1638_v40 = vmax.f32 %v1577_v9, 0.0  ;;  %2492 = vmatmul.msk.bf16.gmra.mxu1 %vm154_vm1, %v3323_v17  ;;  %v1413_v17 = vadd.f32 %v3376_v52, %v1381_v60  ;;  %v1915_v52 = vmax.f32 %v1870_v27, 0.0  ;;  %v1388_v45 = vmax.f32 %v1351_v44, 0.0 }
 0x322   :  { %v2185_v27 = vmax.f32 %v2146_v59, 0.0 }
 0x323   :  { %v2148_v58 = vpop.f32.mrf.mxu3  ;;  %v1670_v30 = vadd.f32 %v1669_v7, %v1638_v40  ;;  %v1414_v39 = vadd.f32 %v1413_v17, %v1382_v2  ;;  %v1947_v53 = vadd.f32 %v1946_v12, %v1915_v52  ;;  %v1387_v40 = vmax.f32 %v1348_v49, 0.0  ;;  %v2243_v17 = vld [vmem:[#allocation8 + $0x40] sm:$0xff] }
 0x324   :  { %v2149_v35 = vadd.f32 %v3390_v31, %v2148_v58  ;;  %v2215_v2 = vadd.f32 %v2214_v14, %v2183_v46  ;;  %2262 = vmatpush.msra.mxu0 %v2243_v17 }
 0x325   :  { %v3430_v13 = vpop.f32.mrf.mxu2  ;;  %v1415_v56 = vadd.f32 %v1414_v39, %v1383_v5  ;;  %v1948_v23 = vadd.f32 %v1947_v53, %v1916_v16 }
 0x326   :  { %v1352_v29 = vpop.f32.mrf.mxu0  ;;  %v1578_v43 = vpop.f32.mrf.mxu1  ;;  %v1883_v28 = vadd.f32 %v3390_v31, %v3430_v13  ;;  %v2186_v5 = vmax.f32 %v2149_v35, 0.0  ;;  %2263 = vmatpush.msra.mxu0 %v2242_v20 }
 0x327   :  { %v1579_v51 = vadd.f32 %v3390_v31, %v1578_v43  ;;  %v1416_v50 = vadd.f32 %v1415_v56, %v1384_v25  ;;  %v1353_v47 = vadd.f32 %v3390_v31, %v1352_v29  ;;  %v1918_v29 = vmax.f32 %v1878_v8, 0.0 }
 0x328   :  { %v2216_v43 = vadd.f32 %v2215_v2, %v2184_v26  ;;  %v1949_v39 = vadd.f32 %v1948_v23, %v1917_v22  ;;  %v1920_v33 = vmax.f32 %v1883_v28, 0.0  ;;  %2264 = vmatpush.msra.mxu0 %v2241_v0 }
 0x329   :  { %v1639_v34 = vmax.f32 %v1579_v51, 0.0  ;;  %v1417_v4 = vadd.f32 %v1416_v50, %v1385_v32  ;;  %v1389_v48 = vmax.f32 %v1353_v47, 0.0 }
 0x32a   :  { %v2217_v11 = vadd.f32 %v2216_v43, %v2185_v27  ;;  %v1950_v3 = vadd.f32 %v1949_v39, %v1918_v29 }
 0x32b   :  { %v2150_v19 = vpop.f32.mrf.mxu3  ;;  %v1671_v6 = vadd.f32 %v1670_v30, %v1639_v34  ;;  %v1418_v37 = vadd.f32 %v1417_v4, %v1386_v57 }
 0x32c   :  { %v2151_v63 = vadd.f32 %v3390_v31, %v2150_v19  ;;  %v2218_v19 = vadd.f32 %v2217_v11, %v2186_v5  ;;  %v1951_v16 = vadd.f32 %v1950_v3, %v1919_v38  ;;  %v1924_v11 = vld [vmem:[#allocation2 + $0x6] sm:$0x1] }
 0x32d   :  { %v1884_v7 = vpop.f32.mrf.mxu2  ;;  %v1419_v36 = vadd.f32 %v1418_v37, %v1387_v40  ;;  %v2240_v3 = vld [vmem:[#allocation8 + $0x28] sm:$0xff] }
 0x32e   :  { %v1355_v9 = vpop.f32.mrf.mxu0  ;;  %v1581_v54 = vpop.f32.mrf.mxu1  ;;  %v1885_v52 = vadd.f32 %v3390_v31, %v1884_v7  ;;  %v2187_v12 = vmax.f32 %v2151_v63, 0.0  ;;  %2265 = vmatpush.msra.mxu0 %v2240_v3  ;;  %v1658_v3 = vld [vmem:[#allocation2 + $0x5] sm:$0x1] }
 0x32f   :  { %v1582_v60 = vadd.f32 %v3390_v31, %v1581_v54  ;;  %v1356_v30 = vadd.f32 %v3390_v31, %v1355_v9  ;;  %v1420_v61 = vadd.f32 %v1419_v36, %v1388_v45  ;;  %v1392_v36 = vld [vmem:[#allocation2 + $0x4] sm:$0x1] }
 0x330   :  { %v1921_v41 = vmax.f32 %v1885_v52, 0.0  ;;  %v2219_v50 = vadd.f32 %v2218_v19, %v2187_v12 }
 0x331   :  { %v1640_v10 = vmax.f32 %v1582_v60, 0.0  ;;  %2493 = vmatmul.msk.bf16.gmra.mxu1 %vm154_vm1, %v1488_v15  ;;  %v1390_v51 = vmax.f32 %v1356_v30, 0.0  ;;  %v1421_v34 = vadd.f32 %v1420_v61, %v1389_v48  ;;  %v1952_v15 = vadd.f32 %v1951_v16, %v1920_v33 }
 0x333   :  { %v2153_v24 = vpop.f32.mrf.mxu3  ;;  %v1672_v58 = vadd.f32 %v1671_v6, %v1640_v10  ;;  %v1422_v32 = vadd.f32 %v1421_v34, %v1390_v51  ;;  %v1953_v54 = vadd.f32 %v1952_v15, %v1921_v41  ;;  %v2239_v41 = vld [vmem:[#allocation8 + $0x20] sm:$0xff]  ;;  %v2237_v15 = vld [vmem:[#allocation8 + $0x10] sm:$0xff] }
 0x334   :  { %v2154_v18 = vadd.f32 %v3390_v31, %v2153_v24  ;;  %2266 = vmatpush.msra.mxu0 %v2239_v41 }
 0x335   :  { %v1887_v55 = vpop.f32.mrf.mxu2 }
 0x336   :  { %v1357_v25 = vpop.f32.mrf.mxu0  ;;  %v1583_v21 = vpop.f32.mrf.mxu1  ;;  %v1888_v56 = vadd.f32 %v3390_v31, %v1887_v55  ;;  %v2188_v49 = vmax.f32 %v2154_v18, 0.0  ;;  %v2190_v55 = vld [vmem:[#allocation2 + $0x7] sm:$0x1] }
 0x337   :  { %v1358_v62 = vadd.f32 %v3390_v31, %v1357_v25  ;;  %v1584_v13 = vadd.f32 %v3390_v31, %v1583_v21 }
 0x338   :  { %v1922_v14 = vmax.f32 %v1888_v56, 0.0  ;;  %v2220_v1 = vadd.f32 %v2219_v50, %v2188_v49 }
 0x339   :  { %v1391_v6 = vmax.f32 %v1358_v62, 0.0  ;;  %v1641_v42 = vmax.f32 %v1584_v13, 0.0 }
 0x33a   :  { %v1954_v8 = vadd.f32 %v1953_v54, %v1922_v14 }
 0x33b   :  { %v2155_v53 = vpop.f32.mrf.mxu3  ;;  %v1423_v57 = vadd.f32 %v1422_v32, %v1391_v6  ;;  %v1673_v44 = vadd.f32 %v1672_v58, %v1641_v42 }
 0x33c   :  { %v2156_v7 = vadd.f32 %v3390_v31, %v2155_v53 }
 0x33d   :  { %v1424_v46 = vrot.slane %v1423_v57, 4  ;;  %v1889_v59 = vpop.f32.mrf.mxu2 }
 0x33e   :  { %v2189_v9 = vmax.f32 %v2156_v7, 0.0  ;;  %v1890_v4 = vadd.f32 %v3390_v31, %v1889_v59  ;;  %v1586_v40 = vpop.f32.mrf.mxu1 }
 0x33f   :  { %v1425_v47 = vadd.f32 %v1424_v46, %v1423_v57  ;;  %v1587_v23 = vadd.f32 %v3390_v31, %v1586_v40  ;;  %v2238_v57 = vld [vmem:[#allocation8 + $0x18] sm:$0xff]  ;;  %v2236_v46 = vld [vmem:[#allocation8 + $0x8] sm:$0xff] }
 0x340   :  { %v2221_v60 = vadd.f32 %v2220_v1, %v2189_v9  ;;  %v1923_v26 = vmax.f32 %v1890_v4, 0.0  ;;  %2267 = vmatpush.msra.mxu0 %v2238_v57 }
 0x341   :  { %v1426_v35 = vrot.slane %v1425_v47, 2  ;;  %v1642_v45 = vmax.f32 %v1587_v23, 0.0 }
 0x342   :  { %v2222_v37 = vrot.slane %v2221_v60, 4  ;;  %v1955_v30 = vadd.f32 %v1954_v8, %v1923_v26  ;;  %2268 = vmatpush.msra.mxu0 %v2237_v15 }
 0x343   :  { %v1427_v10 = vadd.f32 %v1426_v35, %v1425_v47  ;;  %v1674_v2 = vadd.f32 %v1673_v44, %v1642_v45 }
 0x344   :  { %v2223_v22 = vadd.f32 %v2222_v37, %v2221_v60  ;;  %v1956_v27 = vrot.slane %v1955_v30, 4  ;;  %2269 = vmatpush.msra.mxu0 %v2236_v46 }
 0x345   :  { %v1428_v24 = vrot.slane %v1427_v10, 1 }
 0x346   :  { %v2224_v17 = vrot.slane %v2223_v22, 2  ;;  %v1957_v48 = vadd.f32 %v1956_v27, %v1955_v30  ;;  %v1588_v63 = vpop.f32.mrf.mxu1  ;;  %v2235_v27 = vld [vmem:[#allocation8] sm:$0xff] }
 0x347   :  { %v1429_v58 = vadd.f32 %v1428_v24, %v1427_v10  ;;  %v1589_v29 = vadd.f32 %v3390_v31, %v1588_v63  ;;  %2270 = vmatpush.msra.mxu0 %v2235_v27 }
 0x348   :  { %v2225_v20 = vadd.f32 %v2224_v17, %v2223_v22  ;;  %v1958_v43 = vrot.slane %v1957_v48, 2 }
 0x349   :  { %v1430_v28 = vadd.f32 %v1429_v58, %v1392_v36  ;;  %v1643_v61 = vmax.f32 %v1589_v29, 0.0 }
 0x34a   :  { %v2226_v5 = vrot.slane %v2225_v20, 1  ;;  %v1959_v51 = vadd.f32 %v1958_v43, %v1957_v48 }
 0x34b   :  { %1431 = vst [vmem:[#allocation2 + $0x4] sm:$0x1] %v1430_v28  ;;  %v1675_v39 = vadd.f32 %v1674_v2, %v1643_v61 }
 0x34c   :  { %v2227_v18 = vadd.f32 %v2226_v5, %v2225_v20  ;;  %v1960_v38 = vrot.slane %v1959_v51, 1 }
 0x34e   :  { %v2228_v52 = vadd.f32 %v2227_v18, %v2190_v55  ;;  %v1961_v25 = vadd.f32 %v1960_v38, %v1959_v51  ;;  %v1591_v21 = vpop.f32.mrf.mxu1 }
 0x34f   :  { %v1592_v34 = vadd.f32 %v3390_v31, %v1591_v21 }
 0x350   :  { %2229 = vst [vmem:[#allocation2 + $0x7] sm:$0x1] %v2228_v52  ;;  %v1962_v12 = vadd.f32 %v1961_v25, %v1924_v11 }
 0x351   :  { %v1644_v62 = vmax.f32 %v1592_v34, 0.0 }
 0x352   :  { %1963 = vst [vmem:[#allocation2 + $0x6] sm:$0x1] %v1962_v12 }
 0x353   :  { %v1676_v13 = vadd.f32 %v1675_v39, %v1644_v62 }
 0x356   :  { %v1593_v33 = vpop.f32.mrf.mxu1 }
 0x357   :  { %v1594_v19 = vadd.f32 %v3390_v31, %v1593_v33 }
 0x359   :  { %v1645_v56 = vmax.f32 %v1594_v19, 0.0 }
 0x35b   :  { %v1677_v32 = vadd.f32 %v1676_v13, %v1645_v56 }
 0x35e   :  { %v1596_v49 = vpop.f32.mrf.mxu1 }
 0x35f   :  { %v1597_v6 = vadd.f32 %v3390_v31, %v1596_v49  ;;  %v2603_v49 = vld [vmem:[%s3495_s4] ss:$0 sm:$0xff] }
 0x361   :  { %v1646_v42 = vmax.f32 %v1597_v6, 0.0 }
 0x363   :  { %v1678_v16 = vadd.f32 %v1677_v32, %v1646_v42 }
 0x366   :  { %v1598_v53 = vpop.f32.mrf.mxu1 }
 0x367   :  { %v1599_v54 = vadd.f32 %v3390_v31, %v1598_v53 }
 0x369   :  { %v1647_v40 = vmax.f32 %v1599_v54, 0.0 }
 0x36b   :  { %v1679_v26 = vadd.f32 %v1678_v16, %v1647_v40 }
 0x36e   :  { %v1601_v50 = vpop.f32.mrf.mxu1 }
 0x36f   :  { %v1602_v4 = vadd.f32 %v3390_v31, %v1601_v50 }
 0x371   :  { %v1648_v60 = vmax.f32 %v1602_v4, 0.0 }
 0x373   :  { %v1680_v45 = vadd.f32 %v1679_v26, %v1648_v60 }
 0x376   :  { %v1603_v44 = vpop.f32.mrf.mxu1 }
 0x377   :  { %v1604_v47 = vadd.f32 %v3390_v31, %v1603_v44 }
 0x379   :  { %v1649_v35 = vmax.f32 %v1604_v47, 0.0 }
 0x37b   :  { %v1681_v22 = vadd.f32 %v1680_v45, %v1649_v35 }
 0x37e   :  { %v1606_v7 = vpop.f32.mrf.mxu1 }
 0x37f   :  { %v1607_v23 = vadd.f32 %v3390_v31, %v1606_v7 }
 0x381   :  { %v1650_v30 = vmax.f32 %v1607_v23, 0.0 }
 0x383   :  { %v1682_v24 = vadd.f32 %v1681_v22, %v1650_v30 }
 0x386   :  { %v1608_v14 = vpop.f32.mrf.mxu1 }
 0x387   :  { %v1609_v37 = vadd.f32 %v3390_v31, %v1608_v14 }
 0x389   :  { %v1651_v2 = vmax.f32 %v1609_v37, 0.0 }
 0x38b   :  { %v1683_v63 = vadd.f32 %v1682_v24, %v1651_v2 }
 0x38e   :  { %v1611_v1 = vpop.f32.mrf.mxu1 }
 0x38f   :  { %v1612_v10 = vadd.f32 %v3390_v31, %v1611_v1 }
 0x391   :  { %v1652_v17 = vmax.f32 %v1612_v10, 0.0 }
 0x393   :  { %v1684_v29 = vadd.f32 %v1683_v63, %v1652_v17 }
 0x396   :  { %v1613_v59 = vpop.f32.mrf.mxu1 }
 0x397   :  { %v1614_v0 = vadd.f32 %v3390_v31, %v1613_v59 }
 0x399   :  { %v1653_v58 = vmax.f32 %v1614_v0, 0.0 }
 0x39b   :  { %v1685_v5 = vadd.f32 %v1684_v29, %v1653_v58 }
 0x39e   :  { %v1616_v9 = vpop.f32.mrf.mxu1 }
 0x39f   :  { %v1617_v36 = vadd.f32 %v3390_v31, %v1616_v9 }
 0x3a1   :  { %v1654_v43 = vmax.f32 %v1617_v36, 0.0 }
 0x3a3   :  { %v1686_v51 = vadd.f32 %v1685_v5, %v1654_v43 }
 0x3a6   :  { %v1618_v8 = vpop.f32.mrf.mxu1 }
 0x3a7   :  { %v1619_v20 = vadd.f32 %v3390_v31, %v1618_v8 }
 0x3a9   :  { %v1655_v61 = vmax.f32 %v1619_v20, 0.0 }
 0x3ab   :  { %v1687_v39 = vadd.f32 %v1686_v51, %v1655_v61 }
 0x3ae   :  { %v1621_v48 = vpop.f32.mrf.mxu1 }
 0x3af   :  { %v1622_v28 = vadd.f32 %v3390_v31, %v1621_v48 }
 0x3b1   :  { %v1656_v55 = vmax.f32 %v1622_v28, 0.0 }
 0x3b3   :  { %v1688_v11 = vadd.f32 %v1687_v39, %v1656_v55 }
 0x3b6   :  { %v1623_v18 = vpop.f32.mrf.mxu1 }
 0x3b7   :  { %v1624_v38 = vadd.f32 %v3390_v31, %v1623_v18 }
 0x3b9   :  { %v1657_v52 = vmax.f32 %v1624_v38, 0.0 }
 0x3bb   :  { %v1689_v25 = vadd.f32 %v1688_v11, %v1657_v52 }
 0x3bd   :  { %v1690_v21 = vrot.slane %v1689_v25, 4 }
 0x3bf   :  { %v1691_v34 = vadd.f32 %v1690_v21, %v1689_v25 }
 0x3c1   :  { %v1692_v12 = vrot.slane %v1691_v34, 2 }
 0x3c3   :  { %v1693_v62 = vadd.f32 %v1692_v12, %v1691_v34 }
 0x3c5   :  { %v1694_v13 = vrot.slane %v1693_v62, 1 }
 0x3c7   :  { %v1695_v33 = vadd.f32 %v1694_v13, %v1693_v62 }
 0x3c9   :  { %v1696_v19 = vadd.f32 %v1695_v33, %v1658_v3 }
 0x3cb   :  { %1697 = vst [vmem:[#allocation2 + $0x5] sm:$0x1] %v1696_v19 }
 0x3d2   :  { %v2233_v56 = vld [vmem:[#allocation2] sm:$0xff] }
 0x3d3   :  { %v2234_v32 = vmul.f32 0.00390625, %v2233_v56 }
 0x3d5   :  { %2271 = vmatmul.f32.vlgmr.msra.gmra.mxu0 %v2234_v32 }
 0x452   :  { %v2272_v31 = vpop.f32.mrf.mxu0 }
 0x453   :  { %v2273_v6 = vadd.f32 %v2603_v49, %v2272_v31 }
 0x455   :  { %2275 = vst [vmem:[#allocation9] sm:$0xff] %v2273_v6 }
 0x456   :  { %2286 = dma.vmem_to_hbm [thread:$0]  %s2282_s17, 128, %s2284_s20, [#allocation5]  }
 0x457   :  { %2706 = dma.done.wait [#allocation5], 128  }
 0x458   :  { %2707 = vsyncadd [#allocation5], 4294967168 }
 0x459   :  { %2291 = vsyncpa [#allocation4], 1 }
 0x45a   :  { %2292 = vsyncpa [#allocation7], 1 }
 0x45b   :  { %2293 = vsyncpa [#allocation5], 1 }

</bundles_post_ra>
